<compile_context>
chip_gen: v7x
topology: tpu7x:2x2x1
jax: 0.10.0
libtpu: 0.0.40
codegen_flags: <defaults>
</compile_context>

<pallas_src>
import functools

import jax
import jax.numpy as jnp
from jax.experimental import pallas as pl
from jax.experimental.pallas import tpu as pltpu

HIDDEN_SIZE = 32
KERNEL_SIZE = 1          # args.kernel_size == 1 -> padding 0, pure 1x1 conv
BN_EPS = 1e-5
SKIP_DIMS_IN = [512, 256, 128, 64, 64]   # get_skip_dims('resnet34')
_FUSED_VMEM_BUDGET = 8 << 20             # fuse conv+BN when y fits easily in VMEM


def _vmem_limit(nbytes):
    # Scoped-VMEM limit derived from the actual working set, clamped so it is
    # valid on every generation (v5e 16 MiB default scoped, v7x 64 MiB physical).
    return int(min(max(2 * nbytes + (4 << 20), 16 << 20), 40 << 20))


# ----------------------------------------------------------------------------
# Fused kernel (small feature maps): conv + batch stats + BN apply in one call.
#   grid = (phase, n, t), fully sequential ("arbitrary").
#   phase 0: y = W @ x tile (f32 acc), kept resident in VMEM, channel moments
#            accumulated in VMEM scratch.
#   phase 1: at the first step compute scale/shift from the batch statistics,
#            then apply y*scale + shift tile by tile and store (f32 output).
# ----------------------------------------------------------------------------
def _fused_conv_bn_kernel(hw, block_w, num_t, count,
                          x_ref, w_ref, gamma_ref, beta_ref, o_ref,
                          y_buf, s1_buf, s2_buf, scale_buf, shift_buf):
    p = pl.program_id(0)
    n = pl.program_id(1)
    t = pl.program_id(2)
    slot = n * num_t + t

    @pl.when(p == 0)
    def _conv_and_moments():
        @pl.when((n == 0) & (t == 0))
        def _init():
            s1_buf[...] = jnp.zeros_like(s1_buf)
            s2_buf[...] = jnp.zeros_like(s2_buf)

        # bf16 inputs, f32 accumulation on the MXU.
        y = jnp.dot(w_ref[...], x_ref[...],
                    preferred_element_type=jnp.float32)        # (Cout, T) f32
        y_buf[slot] = y                                         # stays in VMEM

        if hw % block_w != 0:
            # Ragged last tile: mask out-of-range pixel columns from the stats.
            col = (jax.lax.broadcasted_iota(jnp.int32, y.shape, 1)
                   + t * block_w)
            y = jnp.where(col < hw, y, 0.0)

        # Stats always come from the f32 accumulator (never from a rounded y).
        s1_buf[...] += jnp.sum(y, axis=1, keepdims=True)
        s2_buf[...] += jnp.sum(y * y, axis=1, keepdims=True)

    @pl.when(p == 1)
    def _normalize():
        @pl.when((n == 0) & (t == 0))
        def _finalize_stats():
            mu = s1_buf[...] / count
            var = jnp.maximum(s2_buf[...] / count - mu * mu, 0.0)
            inv_std = jax.lax.rsqrt(var + BN_EPS)
            g = gamma_ref[...]
            scale_buf[...] = g * inv_std
            shift_buf[...] = beta_ref[...] - mu * g * inv_std

        o_ref[...] = (y_buf[slot] * scale_buf[...]
                      + shift_buf[...]).astype(o_ref.dtype)


# ----------------------------------------------------------------------------
# Two-pass fallback (large feature maps).
# Pass 1: 1x1 conv (bf16 streamed, f32 acc), bf16 y intermediate, per-batch
#         channel moments accumulated in a resident (Cout, 1) output block.
# ----------------------------------------------------------------------------
def _conv_moments_kernel(hw, block_w, x_ref, w_ref, y_ref, s1_ref, s2_ref):
    t = pl.program_id(1)

    @pl.when(t == 0)
    def _init():
        s1_ref[...] = jnp.zeros_like(s1_ref)
        s2_ref[...] = jnp.zeros_like(s2_ref)

    y = jnp.dot(w_ref[...], x_ref[...], preferred_element_type=jnp.float32)
    y_ref[...] = y.astype(y_ref.dtype)          # bf16 intermediate writeback

    if hw % block_w != 0:
        col = (jax.lax.broadcasted_iota(jnp.int32, y.shape, 1) + t * block_w)
        y = jnp.where(col < hw, y, 0.0)

    # Moments from the f32 accumulator, not the bf16-stored y.
    s1_ref[...] += jnp.sum(y, axis=1, keepdims=True)
    s2_ref[...] += jnp.sum(y * y, axis=1, keepdims=True)


# Pass 2: out = y*scale + shift with a large, lane-dense pixel tile.
def _bn_apply_kernel(y_ref, scale_ref, shift_ref, o_ref):
    y = y_ref[...].astype(jnp.float32)
    o_ref[...] = (y * scale_ref[...] + shift_ref[...]).astype(o_ref.dtype)


def conv1x1_bn(x_nchw, w, b, gamma, beta, *, tile_hw=2048, fuse=None):
    """1x1 Conv2d(Cin->Cout) + BatchNorm2d(Cout) with training-mode batch stats.

    NCHW-native; the HW axis is tiled over a grid.  The conv bias `b` is
    mathematically cancelled by BN's mean subtraction, so it is not fed to the
    kernel.  (If an eval-mode/running-stats BN path were ever added, the bias
    would no longer cancel.)
    """
    del b  # exactly cancelled by the BatchNorm mean subtraction (training mode)
    # TODO(synk): kernel_size == 3 (padding=1) path would need an im2col stage;
    # only the kernel_size == 1 configuration is implemented here.
    assert tile_hw % 128 == 0
    N, Cin, H, W = x_nchw.shape
    Cout = w.shape[0]
    HW = H * W
    T = HW if HW <= tile_hw else tile_hw          # full dim or 128-multiple
    num_t = -(-HW // T)
    count = float(N * HW)

    # HBM-bound: stream activations and weights in bf16, accumulate in f32.
    x3 = x_nchw.reshape(N, Cin, HW).astype(jnp.bfloat16)
    w2 = w.reshape(Cout, Cin).astype(jnp.bfloat16)
    gamma_c = gamma.astype(jnp.float32).reshape(Cout, 1)
    beta_c = beta.astype(jnp.float32).reshape(Cout, 1)

    # VMEM working set of the fused variant: double-buffered x tile, resident
    # f32 y, double-buffered output tile, weights, stat scratches.
    fused_bytes = (2 * Cin * T * 2
                   + N * num_t * Cout * T * 4
                   + 2 * Cout * T * 4
                   + Cout * Cin * 2 + 8 * Cout * 4)
    if fuse is None:
        fuse = fused_bytes <= _FUSED_VMEM_BUDGET

    if fuse:
        cost = pl.CostEstimate(
            flops=int(2 * N * HW * Cin * Cout + 4 * N * HW * Cout),
            transcendentals=0,
            bytes_accessed=int(N * HW * Cin * 2 + Cout * Cin * 2
                               + N * HW * Cout * 4 + 4 * Cout * 4))
        out = pl.pallas_call(
            functools.partial(_fused_conv_bn_kernel, HW, T, num_t, count),
            grid=(2, N, num_t),
            in_specs=[
                # phase 1 pins the x index -> no extra activation DMAs.
                pl.BlockSpec((None, Cin, T),
                             lambda p, n, t: ((1 - p) * n, 0, (1 - p) * t)),
                pl.BlockSpec((Cout, Cin), lambda p, n, t: (0, 0)),
                pl.BlockSpec((Cout, 1), lambda p, n, t: (0, 0)),
                pl.BlockSpec((Cout, 1), lambda p, n, t: (0, 0)),
            ],
            # phase 0 pins the output index -> no writeback of unwritten tiles.
            out_specs=pl.BlockSpec((None, Cout, T),
                                   lambda p, n, t: (p * n, 0, p * t)),
            out_shape=jax.ShapeDtypeStruct((N, Cout, HW), jnp.float32),
            scratch_shapes=[
                pltpu.VMEM((N * num_t, Cout, T), jnp.float32),   # resident y
                pltpu.VMEM((Cout, 1), jnp.float32),              # sum(y)
                pltpu.VMEM((Cout, 1), jnp.float32),              # sum(y*y)
                pltpu.VMEM((Cout, 1), jnp.float32),              # scale
                pltpu.VMEM((Cout, 1), jnp.float32),              # shift
            ],
            compiler_params=pltpu.CompilerParams(
                dimension_semantics=("arbitrary", "arbitrary", "arbitrary"),
                vmem_limit_bytes=_vmem_limit(fused_bytes)),
            cost_estimate=cost,
        )(x3, w2, gamma_c, beta_c)
        return out.reshape(N, Cout, H, W)

    # -------------------- two-pass fallback (large HW) --------------------
    p1_bytes = 2 * Cin * T * 2 + 2 * Cout * T * 2 + Cout * Cin * 2 + 8 * Cout * 4
    cost1 = pl.CostEstimate(
        flops=int(2 * N * HW * Cin * Cout),
        transcendentals=0,
        bytes_accessed=int(N * HW * Cin * 2 + Cout * Cin * 2
                           + N * HW * Cout * 2 + 2 * N * Cout * 4))
    y, s1, s2 = pl.pallas_call(
        functools.partial(_conv_moments_kernel, HW, T),
        grid=(N, num_t),
        in_specs=[
            pl.BlockSpec((None, Cin, T), lambda n, t: (n, 0, t)),
            pl.BlockSpec((Cout, Cin), lambda n, t: (0, 0)),
        ],
        out_specs=(
            pl.BlockSpec((None, Cout, T), lambda n, t: (n, 0, t)),
            pl.BlockSpec((None, Cout, 1), lambda n, t: (n, 0, 0)),  # resident acc
            pl.BlockSpec((None, Cout, 1), lambda n, t: (n, 0, 0)),  # resident acc
        ),
        out_shape=(
            jax.ShapeDtypeStruct((N, Cout, HW), jnp.bfloat16),      # y intermediate
            jax.ShapeDtypeStruct((N, Cout, 1), jnp.float32),
            jax.ShapeDtypeStruct((N, Cout, 1), jnp.float32),
        ),
        compiler_params=pltpu.CompilerParams(
            dimension_semantics=("parallel", "arbitrary"),
            vmem_limit_bytes=_vmem_limit(p1_bytes)),
        cost_estimate=cost1,
    )(x3, w2)

    # Tiny global reduction for the batch statistics (biased variance, as in
    # nn.BatchNorm2d training-mode forward).
    sum_y = jnp.sum(s1, axis=0)[:, 0]                       # (Cout,)
    sum_y2 = jnp.sum(s2, axis=0)[:, 0]                      # (Cout,)
    mu = sum_y / count
    var = jnp.maximum(sum_y2 / count - mu * mu, 0.0)        # clamp: no NaN rsqrt
    inv_std = jax.lax.rsqrt(var + BN_EPS)
    g = gamma.astype(jnp.float32)
    scale = (g * inv_std).reshape(Cout, 1)
    shift = (beta.astype(jnp.float32) - mu * g * inv_std).reshape(Cout, 1)

    # Pass 2 gets its own, much larger pixel tile (pure bandwidth pass).
    T2 = HW if HW <= 8192 else 8192
    num_t2 = -(-HW // T2)
    p2_bytes = 2 * Cout * T2 * 2 + 2 * Cout * T2 * 4 + 8 * Cout * 4
    cost2 = pl.CostEstimate(
        flops=int(2 * N * HW * Cout),
        transcendentals=0,
        bytes_accessed=int(N * HW * Cout * 2 + N * HW * Cout * 4 + 2 * Cout * 4))
    out = pl.pallas_call(
        _bn_apply_kernel,
        grid=(N, num_t2),
        in_specs=[
            pl.BlockSpec((None, Cout, T2), lambda n, t: (n, 0, t)),
            pl.BlockSpec((Cout, 1), lambda n, t: (0, 0)),
            pl.BlockSpec((Cout, 1), lambda n, t: (0, 0)),
        ],
        out_specs=pl.BlockSpec((None, Cout, T2), lambda n, t: (n, 0, t)),
        out_shape=jax.ShapeDtypeStruct((N, Cout, HW), jnp.float32),
        compiler_params=pltpu.CompilerParams(
            dimension_semantics=("parallel", "parallel"),
            vmem_limit_bytes=_vmem_limit(p2_bytes)),
        cost_estimate=cost2,
    )(y, scale, shift)

    return out.reshape(N, Cout, H, W)


# ----------------------------------------------------------------------------
# Plain-JAX references for the translated hot path (correctness checks)
# ----------------------------------------------------------------------------
def _reference_conv_bn(x, w, b, gamma, beta):
    Cout = w.shape[0]
    w2 = w.reshape(Cout, -1)
    y = jnp.einsum("oc,nchw->nohw", w2, x) + b[None, :, None, None]
    mu = jnp.mean(y, axis=(0, 2, 3), keepdims=True)
    var = jnp.mean((y - mu) ** 2, axis=(0, 2, 3), keepdims=True)
    return ((y - mu) * jax.lax.rsqrt(var + BN_EPS)
            * gamma[None, :, None, None] + beta[None, :, None, None])


def _reference_conv_bn_bf16(x, w, b, gamma, beta):
    # Same math, but with x / w rounded to bf16 like the kernel streams them.
    return _reference_conv_bn(x.astype(jnp.bfloat16).astype(jnp.float32),
                              w.astype(jnp.bfloat16).astype(jnp.float32),
                              b, gamma, beta)


# ----------------------------------------------------------------------------
# Deterministic stub for the pretrained base network (glue, plain JAX)
# ----------------------------------------------------------------------------
def make_base_stub_params(key):
    keys = jax.random.split(key, 5)
    projs = []
    for k, c in zip(keys, SKIP_DIMS_IN):
        projs.append(jax.random.normal(k, (3, c), dtype=jnp.float32) * 0.1)
    return projs


def base_stub(x, projs):
    """Produces x5, x4, x3, x2, x1 with ResNet34 channel counts.

    # TODO(synk): the real pretrained ResNet34 backbone is checkpoint-loaded in
    # the original module and has no clean in-script Pallas equivalent; this is
    # a deterministic multi-scale feature stub with matching shapes.
    """
    feats = []
    strides = [16, 8, 4, 2, 2]   # x5 smallest .. x1
    for proj, s in zip(projs, strides):
        pooled = jax.lax.reduce_window(
            x, 0.0, jax.lax.add,
            window_dimensions=(1, 1, s, s),
            window_strides=(1, 1, s, s),
            padding="VALID") / float(s * s)
        f = jnp.einsum("nchw,cd->ndhw", pooled, proj)
        feats.append(f)
    x5, x4, x3, x2, x1 = feats
    return x5, x4, x3, x2, x1


# ----------------------------------------------------------------------------
# FeatureExtractor parameters + forward
# ----------------------------------------------------------------------------
def make_feature_extractor_params(key):
    hs = HIDDEN_SIZE
    specs = [
        ("sk5", SKIP_DIMS_IN[0], hs),
        ("sk4", SKIP_DIMS_IN[1], hs),
        ("sk3", SKIP_DIMS_IN[2], hs // 2),
        ("sk2", SKIP_DIMS_IN[3], hs // 4),
    ]
    params = {}
    keys = jax.random.split(key, len(specs) * 4)
    i = 0
    for name, cin, cout in specs:
        fan_in = cin * KERNEL_SIZE * KERNEL_SIZE
        bound = 1.0 / jnp.sqrt(fan_in)
        w = jax.random.uniform(keys[i], (cout, cin, KERNEL_SIZE, KERNEL_SIZE),
                               minval=-bound, maxval=bound, dtype=jnp.float32)
        b = jax.random.uniform(keys[i + 1], (cout,),
                               minval=-bound, maxval=bound, dtype=jnp.float32)
        gamma = 1.0 + 0.1 * jax.random.normal(keys[i + 2], (cout,), dtype=jnp.float32)
        beta = 0.1 * jax.random.normal(keys[i + 3], (cout,), dtype=jnp.float32)
        params[name] = dict(w=w, b=b, gamma=gamma, beta=beta)
        i += 4
    return params


@functools.partial(jax.jit, static_argnames=("semseg", "raw", "tile_hw"))
def feature_extractor_forward(x, params, base_projs, semseg=False, raw=False,
                              tile_hw=2048):
    x5, x4, x3, x2, x1 = base_stub(x, base_projs)
    x5_skip = conv1x1_bn(x5, **params["sk5"], tile_hw=tile_hw)
    x4_skip = conv1x1_bn(x4, **params["sk4"], tile_hw=tile_hw)
    x3_skip = conv1x1_bn(x3, **params["sk3"], tile_hw=tile_hw)
    x2_skip = conv1x1_bn(x2, **params["sk2"], tile_hw=tile_hw)
    if semseg:
        return x5
    elif raw:
        return (x5, x4, x3, x2, x1)
    else:
        return (x5_skip, x4_skip, x3_skip, x2_skip)


if __name__ == "__main__":
    key = jax.random.PRNGKey(0)
    k_x, k_base, k_params, k_t = jax.random.split(key, 4)

    # NCHW input, small shapes: batch=2, channels=3, spatial=32
    x = jax.random.normal(k_x, (2, 3, 32, 32), dtype=jnp.float32)
    base_projs = make_base_stub_params(k_base)
    params = make_feature_extractor_params(k_params)

    # tile_hw=128 so the largest level (x2, HW=256) exercises the multi-tile
    # fused grid while the smaller levels take the single-tile fused path.
    outs = feature_extractor_forward(x, params, base_projs, tile_hw=128)
    outs = jax.block_until_ready(outs)

    expected_shapes = [
        (2, HIDDEN_SIZE, 2, 2),        # x5_skip
        (2, HIDDEN_SIZE, 4, 4),        # x4_skip
        (2, HIDDEN_SIZE // 2, 8, 8),   # x3_skip
        (2, HIDDEN_SIZE // 4, 16, 16), # x2_skip
    ]
    assert all(o.shape == s for o, s in zip(outs, expected_shapes)), \
        [o.shape for o in outs]
    assert all(bool(jnp.all(jnp.isfinite(o))) for o in outs)

    # Correctness: tight vs. a bf16-input-matched reference, looser vs. the
    # pure-f32 reference (bf16 activation/weight streaming).
    feats = base_stub(x, base_projs)
    for o, f, name in zip(outs, feats, ["sk5", "sk4", "sk3", "sk2"]):
        ref_m = _reference_conv_bn_bf16(f, **params[name])
        ref_f = _reference_conv_bn(f, **params[name])
        assert bool(jnp.allclose(o, ref_m, rtol=2e-2, atol=2e-2)), name
        assert bool(jnp.allclose(o, ref_f, rtol=6e-2, atol=6e-2)), name

    # Ragged multi-tile fused path: HW=200 with tile_hw=128 -> 2 tiles, last
    # tile masked out of the batch statistics.
    xt = jax.random.normal(k_t, (2, 64, 10, 20), dtype=jnp.float32)
    p2 = params["sk2"]
    ref_m = _reference_conv_bn_bf16(xt, **p2)

    out_fused = jax.block_until_ready(
        jax.jit(functools.partial(conv1x1_bn, tile_hw=128, fuse=True))(xt, **p2))
    assert out_fused.shape == (2, HIDDEN_SIZE // 4, 10, 20)
    assert bool(jnp.allclose(out_fused, ref_m, rtol=2e-2, atol=2e-2))

    # Two-pass fallback path (bf16 y intermediate + resident stat accumulators
    # + large lane-dense pass-2 tile), ragged multi-tile case.
    out_2p = jax.block_until_ready(
        jax.jit(functools.partial(conv1x1_bn, tile_hw=128, fuse=False))(xt, **p2))
    assert out_2p.shape == (2, HIDDEN_SIZE // 4, 10, 20)
    assert bool(jnp.allclose(out_2p, ref_m, rtol=2e-2, atol=2e-2))

    # Two-pass fallback, single-tile case (sk5-sized input).
    out_2p5 = jax.block_until_ready(
        jax.jit(functools.partial(conv1x1_bn, fuse=False))(feats[0], **params["sk5"]))
    ref_m5 = _reference_conv_bn_bf16(feats[0], **params["sk5"])
    assert bool(jnp.allclose(out_2p5, ref_m5, rtol=2e-2, atol=2e-2))

    print("KERNEL_OK")
</pallas_src>

<mosaic_0001>
module attributes {stable_mosaic.version = 11 : i64} {
  func.func @_fused_conv_bn_kernel(%arg0: i32, %arg1: i32, %arg2: i32, %arg3: memref<1x512x4xbf16, #tpu.memory_space<vmem>>, %arg4: memref<32x512xbf16, #tpu.memory_space<vmem>>, %arg5: memref<32x1xf32, #tpu.memory_space<vmem>>, %arg6: memref<32x1xf32, #tpu.memory_space<vmem>>, %arg7: memref<1x32x4xf32, #tpu.memory_space<vmem>>, %arg8: memref<2x32x4xf32, #tpu.memory_space<vmem>>, %arg9: memref<32x1xf32, #tpu.memory_space<vmem>>, %arg10: memref<32x1xf32, #tpu.memory_space<vmem>>, %arg11: memref<32x1xf32, #tpu.memory_space<vmem>>, %arg12: memref<32x1xf32, #tpu.memory_space<vmem>>) attributes {dimension_semantics = [#tpu.dimension_semantics<arbitrary>, #tpu.dimension_semantics<arbitrary>, #tpu.dimension_semantics<arbitrary>], iteration_bounds = array<i64: 2, 2, 1>, scalar_prefetch = 0 : i64, scratch_operands = 5 : i64, tpu.core_type = #tpu.core_type<tc>, window_params = [{transform_indices = @transform_0, window_bounds = array<i64: 1, 512, 4>}, {pipeline_mode = #tpu.pipeline_mode<synchronous>, transform_indices = @transform_1, window_bounds = array<i64: 32, 512>}, {pipeline_mode = #tpu.pipeline_mode<synchronous>, transform_indices = @transform_2, window_bounds = array<i64: 32, 1>}, {pipeline_mode = #tpu.pipeline_mode<synchronous>, transform_indices = @transform_3, window_bounds = array<i64: 32, 1>}, {transform_indices = @transform_4, window_bounds = array<i64: 1, 32, 4>}]} {
    %c1_i32 = arith.constant 1 : i32
    %0 = arith.muli %arg1, %c1_i32 : i32
    %1 = arith.addi %0, %arg2 : i32
    %c0_i32 = arith.constant 0 : i32
    %2 = arith.cmpi eq, %arg0, %c0_i32 : i32
    %3 = arith.extui %2 : i1 to i32
    %c0_i32_0 = arith.constant 0 : i32
    %4 = arith.cmpi ne, %3, %c0_i32_0 : i32
    scf.if %4 {
      %c0_i32_3 = arith.constant 0 : i32
      %8 = arith.cmpi eq, %arg1, %c0_i32_3 : i32
      %c0_i32_4 = arith.constant 0 : i32
      %9 = arith.cmpi eq, %arg2, %c0_i32_4 : i32
      %10 = arith.andi %8, %9 : i1
      %11 = arith.extui %10 : i1 to i32
      %c0_i32_5 = arith.constant 0 : i32
      %12 = arith.cmpi ne, %11, %c0_i32_5 : i32
      scf.if %12 {
        %cst_22 = arith.constant 0.000000e+00 : f32
        %32 = vector.broadcast %cst_22 : f32 to vector<32x1xf32>
        %c0_23 = arith.constant 0 : index
        %c0_24 = arith.constant 0 : index
        %33 = vector.load %arg9[%c0_23, %c0_24] : memref<32x1xf32, #tpu.memory_space<vmem>>, vector<32x1xf32>
        tpu.vector_store %arg9[%c0_23, %c0_24], %32 {strides = array<i32>} : memref<32x1xf32, #tpu.memory_space<vmem>>, vector<32x1xf32>,
        %cst_25 = arith.constant 0.000000e+00 : f32
        %34 = vector.broadcast %cst_25 : f32 to vector<32x1xf32>
        %c0_26 = arith.constant 0 : index
        %c0_27 = arith.constant 0 : index
        %35 = vector.load %arg10[%c0_26, %c0_27] : memref<32x1xf32, #tpu.memory_space<vmem>>, vector<32x1xf32>
        tpu.vector_store %arg10[%c0_26, %c0_27], %34 {strides = array<i32>} : memref<32x1xf32, #tpu.memory_space<vmem>>, vector<32x1xf32>,
      } else {
      }
      %c0 = arith.constant 0 : index
      %c0_6 = arith.constant 0 : index
      %13 = vector.load %arg4[%c0, %c0_6] : memref<32x512xbf16, #tpu.memory_space<vmem>>, vector<32x512xbf16>
      %c0_7 = arith.constant 0 : index
      %c0_8 = arith.constant 0 : index
      %c0_9 = arith.constant 0 : index
      %14 = vector.load %arg3[%c0_7, %c0_8, %c0_9] : memref<1x512x4xbf16, #tpu.memory_space<vmem>>, vector<1x512x4xbf16>
      %15 = vector.shape_cast %14 : vector<1x512x4xbf16> to vector<512x4xbf16>
      %cst = arith.constant dense<0.000000e+00> : vector<32x4xf32>
      %16 = tpu.matmul %13, %15, %cst {dimension_numbers = #tpu.dot_dimension_numbers<[1], [0], [0], [1], [0, 0, 1, 1], [], []>} : vector<32x512xbf16>, vector<512x4xbf16>, vector<32x4xf32> -> vector<32x4xf32>
      %17 = arith.index_cast %1 : i32 to index
      %c0_10 = arith.constant 0 : index
      %c0_11 = arith.constant 0 : index
      %18 = vector.load %arg8[%17, %c0_10, %c0_11] : memref<2x32x4xf32, #tpu.memory_space<vmem>>, vector<1x32x4xf32>
      %19 = vector.shape_cast %18 : vector<1x32x4xf32> to vector<32x4xf32>
      %20 = vector.shape_cast %16 : vector<32x4xf32> to vector<1x32x4xf32>
      tpu.vector_store %arg8[%17, %c0_10, %c0_11], %20 {strides = array<i32>} : memref<2x32x4xf32, #tpu.memory_space<vmem>>, vector<1x32x4xf32>,
      %c0_12 = arith.constant 0 : index
      %c0_13 = arith.constant 0 : index
      %21 = vector.load %arg9[%c0_12, %c0_13] : memref<32x1xf32, #tpu.memory_space<vmem>>, vector<32x1xf32>
      %cst_14 = arith.constant dense<0.000000e+00> : vector<32xf32>
      %22 = vector.multi_reduction <add>, %16, %cst_14 [1] : vector<32x4xf32> to vector<32xf32>
      %23 = vector.shape_cast %22 : vector<32xf32> to vector<32x1xf32>
      %24 = arith.addf %21, %23 : vector<32x1xf32>
      %c0_15 = arith.constant 0 : index
      %c0_16 = arith.constant 0 : index
      %25 = vector.load %arg9[%c0_15, %c0_16] : memref<32x1xf32, #tpu.memory_space<vmem>>, vector<32x1xf32>
      tpu.vector_store %arg9[%c0_15, %c0_16], %24 {strides = array<i32>} : memref<32x1xf32, #tpu.memory_space<vmem>>, vector<32x1xf32>,
      %c0_17 = arith.constant 0 : index
      %c0_18 = arith.constant 0 : index
      %26 = vector.load %arg10[%c0_17, %c0_18] : memref<32x1xf32, #tpu.memory_space<vmem>>, vector<32x1xf32>
      %27 = arith.mulf %16, %16 : vector<32x4xf32>
      %cst_19 = arith.constant dense<0.000000e+00> : vector<32xf32>
      %28 = vector.multi_reduction <add>, %27, %cst_19 [1] : vector<32x4xf32> to vector<32xf32>
      %29 = vector.shape_cast %28 : vector<32xf32> to vector<32x1xf32>
      %30 = arith.addf %26, %29 : vector<32x1xf32>
      %c0_20 = arith.constant 0 : index
      %c0_21 = arith.constant 0 : index
      %31 = vector.load %arg10[%c0_20, %c0_21] : memref<32x1xf32, #tpu.memory_space<vmem>>, vector<32x1xf32>
      tpu.vector_store %arg10[%c0_20, %c0_21], %30 {strides = array<i32>} : memref<32x1xf32, #tpu.memory_space<vmem>>, vector<32x1xf32>,
    } else {
    }
    %c1_i32_1 = arith.constant 1 : i32
    %5 = arith.cmpi eq, %arg0, %c1_i32_1 : i32
    %6 = arith.extui %5 : i1 to i32
    %c0_i32_2 = arith.constant 0 : i32
    %7 = arith.cmpi ne, %6, %c0_i32_2 : i32
    scf.if %7 {
      %c0_i32_3 = arith.constant 0 : i32
      %8 = arith.cmpi eq, %arg1, %c0_i32_3 : i32
      %c0_i32_4 = arith.constant 0 : i32
      %9 = arith.cmpi eq, %arg2, %c0_i32_4 : i32
      %10 = arith.andi %8, %9 : i1
      %11 = arith.extui %10 : i1 to i32
      %c0_i32_5 = arith.constant 0 : i32
      %12 = arith.cmpi ne, %11, %c0_i32_5 : i32
      scf.if %12 {
        %c0_14 = arith.constant 0 : index
        %c0_15 = arith.constant 0 : index
        %25 = vector.load %arg9[%c0_14, %c0_15] : memref<32x1xf32, #tpu.memory_space<vmem>>, vector<32x1xf32>
        %cst = arith.constant 8.000000e+00 : f32
        %26 = vector.broadcast %cst : f32 to vector<32x1xf32>
        %27 = arith.divf %25, %26 : vector<32x1xf32>
        %c0_16 = arith.constant 0 : index
        %c0_17 = arith.constant 0 : index
        %28 = vector.load %arg10[%c0_16, %c0_17] : memref<32x1xf32, #tpu.memory_space<vmem>>, vector<32x1xf32>
        %cst_18 = arith.constant 8.000000e+00 : f32
        %29 = vector.broadcast %cst_18 : f32 to vector<32x1xf32>
        %30 = arith.divf %28, %29 : vector<32x1xf32>
        %31 = arith.mulf %27, %27 : vector<32x1xf32>
        %32 = arith.subf %30, %31 : vector<32x1xf32>
        %cst_19 = arith.constant 0.000000e+00 : f32
        %33 = vector.broadcast %cst_19 : f32 to vector<32x1xf32>
        %34 = arith.maximumf %32, %33 : vector<32x1xf32>
        %cst_20 = arith.constant 9.99999974E-6 : f32
        %35 = vector.broadcast %cst_20 : f32 to vector<32x1xf32>
        %36 = arith.addf %34, %35 : vector<32x1xf32>
        %37 = math.rsqrt %36 : vector<32x1xf32>
        %c0_21 = arith.constant 0 : index
        %c0_22 = arith.constant 0 : index
        %38 = vector.load %arg5[%c0_21, %c0_22] : memref<32x1xf32, #tpu.memory_space<vmem>>, vector<32x1xf32>
        %39 = arith.mulf %38, %37 : vector<32x1xf32>
        %c0_23 = arith.constant 0 : index
        %c0_24 = arith.constant 0 : index
        %40 = vector.load %arg11[%c0_23, %c0_24] : memref<32x1xf32, #tpu.memory_space<vmem>>, vector<32x1xf32>
        tpu.vector_store %arg11[%c0_23, %c0_24], %39 {strides = array<i32>} : memref<32x1xf32, #tpu.memory_space<vmem>>, vector<32x1xf32>,
        %c0_25 = arith.constant 0 : index
        %c0_26 = arith.constant 0 : index
        %41 = vector.load %arg6[%c0_25, %c0_26] : memref<32x1xf32, #tpu.memory_space<vmem>>, vector<32x1xf32>
        %42 = arith.mulf %27, %38 : vector<32x1xf32>
        %43 = arith.mulf %42, %37 : vector<32x1xf32>
        %44 = arith.subf %41, %43 : vector<32x1xf32>
        %c0_27 = arith.constant 0 : index
        %c0_28 = arith.constant 0 : index
        %45 = vector.load %arg12[%c0_27, %c0_28] : memref<32x1xf32, #tpu.memory_space<vmem>>, vector<32x1xf32>
        tpu.vector_store %arg12[%c0_27, %c0_28], %44 {strides = array<i32>} : memref<32x1xf32, #tpu.memory_space<vmem>>, vector<32x1xf32>,
      } else {
      }
      %13 = arith.index_cast %1 : i32 to index
      %c0 = arith.constant 0 : index
      %c0_6 = arith.constant 0 : index
      %14 = vector.load %arg8[%13, %c0, %c0_6] : memref<2x32x4xf32, #tpu.memory_space<vmem>>, vector<1x32x4xf32>
      %15 = vector.shape_cast %14 : vector<1x32x4xf32> to vector<32x4xf32>
      %c0_7 = arith.constant 0 : index
      %c0_8 = arith.constant 0 : index
      %16 = vector.load %arg11[%c0_7, %c0_8] : memref<32x1xf32, #tpu.memory_space<vmem>>, vector<32x1xf32>
      %17 = vector.broadcast %16 : vector<32x1xf32> to vector<32x4xf32>
      %18 = arith.mulf %15, %17 : vector<32x4xf32>
      %c0_9 = arith.constant 0 : index
      %c0_10 = arith.constant 0 : index
      %19 = vector.load %arg12[%c0_9, %c0_10] : memref<32x1xf32, #tpu.memory_space<vmem>>, vector<32x1xf32>
      %20 = vector.broadcast %19 : vector<32x1xf32> to vector<32x4xf32>
      %21 = arith.addf %18, %20 : vector<32x4xf32>
      %c0_11 = arith.constant 0 : index
      %c0_12 = arith.constant 0 : index
      %c0_13 = arith.constant 0 : index
      %22 = vector.load %arg7[%c0_11, %c0_12, %c0_13] : memref<1x32x4xf32, #tpu.memory_space<vmem>>, vector<1x32x4xf32>
      %23 = vector.shape_cast %22 : vector<1x32x4xf32> to vector<32x4xf32>
      %24 = vector.shape_cast %21 : vector<32x4xf32> to vector<1x32x4xf32>
      tpu.vector_store %arg7[%c0_11, %c0_12, %c0_13], %24 {strides = array<i32>} : memref<1x32x4xf32, #tpu.memory_space<vmem>>, vector<1x32x4xf32>,
    } else {
    }
    return
  }
  func.func @transform_0(%arg0: i32, %arg1: i32, %arg2: i32) -> (i32, i32, i32) {
    %c1_i32 = arith.constant 1 : i32
    %0 = arith.subi %c1_i32, %arg0 : i32
    %1 = arith.muli %0, %arg1 : i32
    %c1_i32_0 = arith.constant 1 : i32
    %2 = arith.subi %c1_i32_0, %arg0 : i32
    %3 = arith.muli %2, %arg2 : i32
    %c0_i32 = arith.constant 0 : i32
    %c0_i32_1 = arith.constant 0 : i32
    return %1, %c0_i32, %3 : i32, i32, i32
  }
  func.func @transform_1(%arg0: i32, %arg1: i32, %arg2: i32) -> (i32, i32) {
    %c0_i32 = arith.constant 0 : i32
    %c0_i32_0 = arith.constant 0 : i32
    %c0_i32_1 = arith.constant 0 : i32
    return %c0_i32, %c0_i32_0 : i32, i32
  }
  func.func @transform_2(%arg0: i32, %arg1: i32, %arg2: i32) -> (i32, i32) {
    %c0_i32 = arith.constant 0 : i32
    %c0_i32_0 = arith.constant 0 : i32
    %c0_i32_1 = arith.constant 0 : i32
    return %c0_i32, %c0_i32_0 : i32, i32
  }
  func.func @transform_3(%arg0: i32, %arg1: i32, %arg2: i32) -> (i32, i32) {
    %c0_i32 = arith.constant 0 : i32
    %c0_i32_0 = arith.constant 0 : i32
    %c0_i32_1 = arith.constant 0 : i32
    return %c0_i32, %c0_i32_0 : i32, i32
  }
  func.func @transform_4(%arg0: i32, %arg1: i32, %arg2: i32) -> (i32, i32, i32) {
    %0 = arith.muli %arg0, %arg1 : i32
    %1 = arith.muli %arg0, %arg2 : i32
    %c0_i32 = arith.constant 0 : i32
    %c0_i32_0 = arith.constant 0 : i32
    return %0, %c0_i32, %1 : i32, i32, i32
  }
}

module attributes {stable_mosaic.version = 11 : i64} {
  func.func @_fused_conv_bn_kernel(%arg0: i32, %arg1: i32, %arg2: i32, %arg3: memref<1x256x16xbf16, #tpu.memory_space<vmem>>, %arg4: memref<32x256xbf16, #tpu.memory_space<vmem>>, %arg5: memref<32x1xf32, #tpu.memory_space<vmem>>, %arg6: memref<32x1xf32, #tpu.memory_space<vmem>>, %arg7: memref<1x32x16xf32, #tpu.memory_space<vmem>>, %arg8: memref<2x32x16xf32, #tpu.memory_space<vmem>>, %arg9: memref<32x1xf32, #tpu.memory_space<vmem>>, %arg10: memref<32x1xf32, #tpu.memory_space<vmem>>, %arg11: memref<32x1xf32, #tpu.memory_space<vmem>>, %arg12: memref<32x1xf32, #tpu.memory_space<vmem>>) attributes {dimension_semantics = [#tpu.dimension_semantics<arbitrary>, #tpu.dimension_semantics<arbitrary>, #tpu.dimension_semantics<arbitrary>], iteration_bounds = array<i64: 2, 2, 1>, scalar_prefetch = 0 : i64, scratch_operands = 5 : i64, tpu.core_type = #tpu.core_type<tc>, window_params = [{transform_indices = @transform_0, window_bounds = array<i64: 1, 256, 16>}, {pipeline_mode = #tpu.pipeline_mode<synchronous>, transform_indices = @transform_1, window_bounds = array<i64: 32, 256>}, {pipeline_mode = #tpu.pipeline_mode<synchronous>, transform_indices = @transform_2, window_bounds = array<i64: 32, 1>}, {pipeline_mode = #tpu.pipeline_mode<synchronous>, transform_indices = @transform_3, window_bounds = array<i64: 32, 1>}, {transform_indices = @transform_4, window_bounds = array<i64: 1, 32, 16>}]} {
    %c1_i32 = arith.constant 1 : i32
    %0 = arith.muli %arg1, %c1_i32 : i32
    %1 = arith.addi %0, %arg2 : i32
    %c0_i32 = arith.constant 0 : i32
    %2 = arith.cmpi eq, %arg0, %c0_i32 : i32
    %3 = arith.extui %2 : i1 to i32
    %c0_i32_0 = arith.constant 0 : i32
    %4 = arith.cmpi ne, %3, %c0_i32_0 : i32
    scf.if %4 {
      %c0_i32_3 = arith.constant 0 : i32
      %8 = arith.cmpi eq, %arg1, %c0_i32_3 : i32
      %c0_i32_4 = arith.constant 0 : i32
      %9 = arith.cmpi eq, %arg2, %c0_i32_4 : i32
      %10 = arith.andi %8, %9 : i1
      %11 = arith.extui %10 : i1 to i32
      %c0_i32_5 = arith.constant 0 : i32
      %12 = arith.cmpi ne, %11, %c0_i32_5 : i32
      scf.if %12 {
        %cst_22 = arith.constant 0.000000e+00 : f32
        %32 = vector.broadcast %cst_22 : f32 to vector<32x1xf32>
        %c0_23 = arith.constant 0 : index
        %c0_24 = arith.constant 0 : index
        %33 = vector.load %arg9[%c0_23, %c0_24] : memref<32x1xf32, #tpu.memory_space<vmem>>, vector<32x1xf32>
        tpu.vector_store %arg9[%c0_23, %c0_24], %32 {strides = array<i32>} : memref<32x1xf32, #tpu.memory_space<vmem>>, vector<32x1xf32>,
        %cst_25 = arith.constant 0.000000e+00 : f32
        %34 = vector.broadcast %cst_25 : f32 to vector<32x1xf32>
        %c0_26 = arith.constant 0 : index
        %c0_27 = arith.constant 0 : index
        %35 = vector.load %arg10[%c0_26, %c0_27] : memref<32x1xf32, #tpu.memory_space<vmem>>, vector<32x1xf32>
        tpu.vector_store %arg10[%c0_26, %c0_27], %34 {strides = array<i32>} : memref<32x1xf32, #tpu.memory_space<vmem>>, vector<32x1xf32>,
      } else {
      }
      %c0 = arith.constant 0 : index
      %c0_6 = arith.constant 0 : index
      %13 = vector.load %arg4[%c0, %c0_6] : memref<32x256xbf16, #tpu.memory_space<vmem>>, vector<32x256xbf16>
      %c0_7 = arith.constant 0 : index
      %c0_8 = arith.constant 0 : index
      %c0_9 = arith.constant 0 : index
      %14 = vector.load %arg3[%c0_7, %c0_8, %c0_9] : memref<1x256x16xbf16, #tpu.memory_space<vmem>>, vector<1x256x16xbf16>
      %15 = vector.shape_cast %14 : vector<1x256x16xbf16> to vector<256x16xbf16>
      %cst = arith.constant dense<0.000000e+00> : vector<32x16xf32>
      %16 = tpu.matmul %13, %15, %cst {dimension_numbers = #tpu.dot_dimension_numbers<[1], [0], [0], [1], [0, 0, 1, 1], [], []>} : vector<32x256xbf16>, vector<256x16xbf16>, vector<32x16xf32> -> vector<32x16xf32>
      %17 = arith.index_cast %1 : i32 to index
      %c0_10 = arith.constant 0 : index
      %c0_11 = arith.constant 0 : index
      %18 = vector.load %arg8[%17, %c0_10, %c0_11] : memref<2x32x16xf32, #tpu.memory_space<vmem>>, vector<1x32x16xf32>
      %19 = vector.shape_cast %18 : vector<1x32x16xf32> to vector<32x16xf32>
      %20 = vector.shape_cast %16 : vector<32x16xf32> to vector<1x32x16xf32>
      tpu.vector_store %arg8[%17, %c0_10, %c0_11], %20 {strides = array<i32>} : memref<2x32x16xf32, #tpu.memory_space<vmem>>, vector<1x32x16xf32>,
      %c0_12 = arith.constant 0 : index
      %c0_13 = arith.constant 0 : index
      %21 = vector.load %arg9[%c0_12, %c0_13] : memref<32x1xf32, #tpu.memory_space<vmem>>, vector<32x1xf32>
      %cst_14 = arith.constant dense<0.000000e+00> : vector<32xf32>
      %22 = vector.multi_reduction <add>, %16, %cst_14 [1] : vector<32x16xf32> to vector<32xf32>
      %23 = vector.shape_cast %22 : vector<32xf32> to vector<32x1xf32>
      %24 = arith.addf %21, %23 : vector<32x1xf32>
      %c0_15 = arith.constant 0 : index
      %c0_16 = arith.constant 0 : index
      %25 = vector.load %arg9[%c0_15, %c0_16] : memref<32x1xf32, #tpu.memory_space<vmem>>, vector<32x1xf32>
      tpu.vector_store %arg9[%c0_15, %c0_16], %24 {strides = array<i32>} : memref<32x1xf32, #tpu.memory_space<vmem>>, vector<32x1xf32>,
      %c0_17 = arith.constant 0 : index
      %c0_18 = arith.constant 0 : index
      %26 = vector.load %arg10[%c0_17, %c0_18] : memref<32x1xf32, #tpu.memory_space<vmem>>, vector<32x1xf32>
      %27 = arith.mulf %16, %16 : vector<32x16xf32>
      %cst_19 = arith.constant dense<0.000000e+00> : vector<32xf32>
      %28 = vector.multi_reduction <add>, %27, %cst_19 [1] : vector<32x16xf32> to vector<32xf32>
      %29 = vector.shape_cast %28 : vector<32xf32> to vector<32x1xf32>
      %30 = arith.addf %26, %29 : vector<32x1xf32>
      %c0_20 = arith.constant 0 : index
      %c0_21 = arith.constant 0 : index
      %31 = vector.load %arg10[%c0_20, %c0_21] : memref<32x1xf32, #tpu.memory_space<vmem>>, vector<32x1xf32>
      tpu.vector_store %arg10[%c0_20, %c0_21], %30 {strides = array<i32>} : memref<32x1xf32, #tpu.memory_space<vmem>>, vector<32x1xf32>,
    } else {
    }
    %c1_i32_1 = arith.constant 1 : i32
    %5 = arith.cmpi eq, %arg0, %c1_i32_1 : i32
    %6 = arith.extui %5 : i1 to i32
    %c0_i32_2 = arith.constant 0 : i32
    %7 = arith.cmpi ne, %6, %c0_i32_2 : i32
    scf.if %7 {
      %c0_i32_3 = arith.constant 0 : i32
      %8 = arith.cmpi eq, %arg1, %c0_i32_3 : i32
      %c0_i32_4 = arith.constant 0 : i32
      %9 = arith.cmpi eq, %arg2, %c0_i32_4 : i32
      %10 = arith.andi %8, %9 : i1
      %11 = arith.extui %10 : i1 to i32
      %c0_i32_5 = arith.constant 0 : i32
      %12 = arith.cmpi ne, %11, %c0_i32_5 : i32
      scf.if %12 {
        %c0_14 = arith.constant 0 : index
        %c0_15 = arith.constant 0 : index
        %25 = vector.load %arg9[%c0_14, %c0_15] : memref<32x1xf32, #tpu.memory_space<vmem>>, vector<32x1xf32>
        %cst = arith.constant 3.200000e+01 : f32
        %26 = vector.broadcast %cst : f32 to vector<32x1xf32>
        %27 = arith.divf %25, %26 : vector<32x1xf32>
        %c0_16 = arith.constant 0 : index
        %c0_17 = arith.constant 0 : index
        %28 = vector.load %arg10[%c0_16, %c0_17] : memref<32x1xf32, #tpu.memory_space<vmem>>, vector<32x1xf32>
        %cst_18 = arith.constant 3.200000e+01 : f32
        %29 = vector.broadcast %cst_18 : f32 to vector<32x1xf32>
        %30 = arith.divf %28, %29 : vector<32x1xf32>
        %31 = arith.mulf %27, %27 : vector<32x1xf32>
        %32 = arith.subf %30, %31 : vector<32x1xf32>
        %cst_19 = arith.constant 0.000000e+00 : f32
        %33 = vector.broadcast %cst_19 : f32 to vector<32x1xf32>
        %34 = arith.maximumf %32, %33 : vector<32x1xf32>
        %cst_20 = arith.constant 9.99999974E-6 : f32
        %35 = vector.broadcast %cst_20 : f32 to vector<32x1xf32>
        %36 = arith.addf %34, %35 : vector<32x1xf32>
        %37 = math.rsqrt %36 : vector<32x1xf32>
        %c0_21 = arith.constant 0 : index
        %c0_22 = arith.constant 0 : index
        %38 = vector.load %arg5[%c0_21, %c0_22] : memref<32x1xf32, #tpu.memory_space<vmem>>, vector<32x1xf32>
        %39 = arith.mulf %38, %37 : vector<32x1xf32>
        %c0_23 = arith.constant 0 : index
        %c0_24 = arith.constant 0 : index
        %40 = vector.load %arg11[%c0_23, %c0_24] : memref<32x1xf32, #tpu.memory_space<vmem>>, vector<32x1xf32>
        tpu.vector_store %arg11[%c0_23, %c0_24], %39 {strides = array<i32>} : memref<32x1xf32, #tpu.memory_space<vmem>>, vector<32x1xf32>,
        %c0_25 = arith.constant 0 : index
        %c0_26 = arith.constant 0 : index
        %41 = vector.load %arg6[%c0_25, %c0_26] : memref<32x1xf32, #tpu.memory_space<vmem>>, vector<32x1xf32>
        %42 = arith.mulf %27, %38 : vector<32x1xf32>
        %43 = arith.mulf %42, %37 : vector<32x1xf32>
        %44 = arith.subf %41, %43 : vector<32x1xf32>
        %c0_27 = arith.constant 0 : index
        %c0_28 = arith.constant 0 : index
        %45 = vector.load %arg12[%c0_27, %c0_28] : memref<32x1xf32, #tpu.memory_space<vmem>>, vector<32x1xf32>
        tpu.vector_store %arg12[%c0_27, %c0_28], %44 {strides = array<i32>} : memref<32x1xf32, #tpu.memory_space<vmem>>, vector<32x1xf32>,
      } else {
      }
      %13 = arith.index_cast %1 : i32 to index
      %c0 = arith.constant 0 : index
      %c0_6 = arith.constant 0 : index
      %14 = vector.load %arg8[%13, %c0, %c0_6] : memref<2x32x16xf32, #tpu.memory_space<vmem>>, vector<1x32x16xf32>
      %15 = vector.shape_cast %14 : vector<1x32x16xf32> to vector<32x16xf32>
      %c0_7 = arith.constant 0 : index
      %c0_8 = arith.constant 0 : index
      %16 = vector.load %arg11[%c0_7, %c0_8] : memref<32x1xf32, #tpu.memory_space<vmem>>, vector<32x1xf32>
      %17 = vector.broadcast %16 : vector<32x1xf32> to vector<32x16xf32>
      %18 = arith.mulf %15, %17 : vector<32x16xf32>
      %c0_9 = arith.constant 0 : index
      %c0_10 = arith.constant 0 : index
      %19 = vector.load %arg12[%c0_9, %c0_10] : memref<32x1xf32, #tpu.memory_space<vmem>>, vector<32x1xf32>
      %20 = vector.broadcast %19 : vector<32x1xf32> to vector<32x16xf32>
      %21 = arith.addf %18, %20 : vector<32x16xf32>
      %c0_11 = arith.constant 0 : index
      %c0_12 = arith.constant 0 : index
      %c0_13 = arith.constant 0 : index
      %22 = vector.load %arg7[%c0_11, %c0_12, %c0_13] : memref<1x32x16xf32, #tpu.memory_space<vmem>>, vector<1x32x16xf32>
      %23 = vector.shape_cast %22 : vector<1x32x16xf32> to vector<32x16xf32>
      %24 = vector.shape_cast %21 : vector<32x16xf32> to vector<1x32x16xf32>
      tpu.vector_store %arg7[%c0_11, %c0_12, %c0_13], %24 {strides = array<i32>} : memref<1x32x16xf32, #tpu.memory_space<vmem>>, vector<1x32x16xf32>,
    } else {
    }
    return
  }
  func.func @transform_0(%arg0: i32, %arg1: i32, %arg2: i32) -> (i32, i32, i32) {
    %c1_i32 = arith.constant 1 : i32
    %0 = arith.subi %c1_i32, %arg0 : i32
    %1 = arith.muli %0, %arg1 : i32
    %c1_i32_0 = arith.constant 1 : i32
    %2 = arith.subi %c1_i32_0, %arg0 : i32
    %3 = arith.muli %2, %arg2 : i32
    %c0_i32 = arith.constant 0 : i32
    %c0_i32_1 = arith.constant 0 : i32
    return %1, %c0_i32, %3 : i32, i32, i32
  }
  func.func @transform_1(%arg0: i32, %arg1: i32, %arg2: i32) -> (i32, i32) {
    %c0_i32 = arith.constant 0 : i32
    %c0_i32_0 = arith.constant 0 : i32
    %c0_i32_1 = arith.constant 0 : i32
    return %c0_i32, %c0_i32_0 : i32, i32
  }
  func.func @transform_2(%arg0: i32, %arg1: i32, %arg2: i32) -> (i32, i32) {
    %c0_i32 = arith.constant 0 : i32
    %c0_i32_0 = arith.constant 0 : i32
    %c0_i32_1 = arith.constant 0 : i32
    return %c0_i32, %c0_i32_0 : i32, i32
  }
  func.func @transform_3(%arg0: i32, %arg1: i32, %arg2: i32) -> (i32, i32) {
    %c0_i32 = arith.constant 0 : i32
    %c0_i32_0 = arith.constant 0 : i32
    %c0_i32_1 = arith.constant 0 : i32
    return %c0_i32, %c0_i32_0 : i32, i32
  }
  func.func @transform_4(%arg0: i32, %arg1: i32, %arg2: i32) -> (i32, i32, i32) {
    %0 = arith.muli %arg0, %arg1 : i32
    %1 = arith.muli %arg0, %arg2 : i32
    %c0_i32 = arith.constant 0 : i32
    %c0_i32_0 = arith.constant 0 : i32
    return %0, %c0_i32, %1 : i32, i32, i32
  }
}

module attributes {stable_mosaic.version = 11 : i64} {
  func.func @_fused_conv_bn_kernel(%arg0: i32, %arg1: i32, %arg2: i32, %arg3: memref<1x128x64xbf16, #tpu.memory_space<vmem>>, %arg4: memref<16x128xbf16, #tpu.memory_space<vmem>>, %arg5: memref<16x1xf32, #tpu.memory_space<vmem>>, %arg6: memref<16x1xf32, #tpu.memory_space<vmem>>, %arg7: memref<1x16x64xf32, #tpu.memory_space<vmem>>, %arg8: memref<2x16x64xf32, #tpu.memory_space<vmem>>, %arg9: memref<16x1xf32, #tpu.memory_space<vmem>>, %arg10: memref<16x1xf32, #tpu.memory_space<vmem>>, %arg11: memref<16x1xf32, #tpu.memory_space<vmem>>, %arg12: memref<16x1xf32, #tpu.memory_space<vmem>>) attributes {dimension_semantics = [#tpu.dimension_semantics<arbitrary>, #tpu.dimension_semantics<arbitrary>, #tpu.dimension_semantics<arbitrary>], iteration_bounds = array<i64: 2, 2, 1>, scalar_prefetch = 0 : i64, scratch_operands = 5 : i64, tpu.core_type = #tpu.core_type<tc>, window_params = [{transform_indices = @transform_0, window_bounds = array<i64: 1, 128, 64>}, {pipeline_mode = #tpu.pipeline_mode<synchronous>, transform_indices = @transform_1, window_bounds = array<i64: 16, 128>}, {pipeline_mode = #tpu.pipeline_mode<synchronous>, transform_indices = @transform_2, window_bounds = array<i64: 16, 1>}, {pipeline_mode = #tpu.pipeline_mode<synchronous>, transform_indices = @transform_3, window_bounds = array<i64: 16, 1>}, {transform_indices = @transform_4, window_bounds = array<i64: 1, 16, 64>}]} {
    %c1_i32 = arith.constant 1 : i32
    %0 = arith.muli %arg1, %c1_i32 : i32
    %1 = arith.addi %0, %arg2 : i32
    %c0_i32 = arith.constant 0 : i32
    %2 = arith.cmpi eq, %arg0, %c0_i32 : i32
    %3 = arith.extui %2 : i1 to i32
    %c0_i32_0 = arith.constant 0 : i32
    %4 = arith.cmpi ne, %3, %c0_i32_0 : i32
    scf.if %4 {
      %c0_i32_3 = arith.constant 0 : i32
      %8 = arith.cmpi eq, %arg1, %c0_i32_3 : i32
      %c0_i32_4 = arith.constant 0 : i32
      %9 = arith.cmpi eq, %arg2, %c0_i32_4 : i32
      %10 = arith.andi %8, %9 : i1
      %11 = arith.extui %10 : i1 to i32
      %c0_i32_5 = arith.constant 0 : i32
      %12 = arith.cmpi ne, %11, %c0_i32_5 : i32
      scf.if %12 {
        %cst_22 = arith.constant 0.000000e+00 : f32
        %32 = vector.broadcast %cst_22 : f32 to vector<16x1xf32>
        %c0_23 = arith.constant 0 : index
        %c0_24 = arith.constant 0 : index
        %33 = vector.load %arg9[%c0_23, %c0_24] : memref<16x1xf32, #tpu.memory_space<vmem>>, vector<16x1xf32>
        tpu.vector_store %arg9[%c0_23, %c0_24], %32 {strides = array<i32>} : memref<16x1xf32, #tpu.memory_space<vmem>>, vector<16x1xf32>,
        %cst_25 = arith.constant 0.000000e+00 : f32
        %34 = vector.broadcast %cst_25 : f32 to vector<16x1xf32>
        %c0_26 = arith.constant 0 : index
        %c0_27 = arith.constant 0 : index
        %35 = vector.load %arg10[%c0_26, %c0_27] : memref<16x1xf32, #tpu.memory_space<vmem>>, vector<16x1xf32>
        tpu.vector_store %arg10[%c0_26, %c0_27], %34 {strides = array<i32>} : memref<16x1xf32, #tpu.memory_space<vmem>>, vector<16x1xf32>,
      } else {
      }
      %c0 = arith.constant 0 : index
      %c0_6 = arith.constant 0 : index
      %13 = vector.load %arg4[%c0, %c0_6] : memref<16x128xbf16, #tpu.memory_space<vmem>>, vector<16x128xbf16>
      %c0_7 = arith.constant 0 : index
      %c0_8 = arith.constant 0 : index
      %c0_9 = arith.constant 0 : index
      %14 = vector.load %arg3[%c0_7, %c0_8, %c0_9] : memref<1x128x64xbf16, #tpu.memory_space<vmem>>, vector<1x128x64xbf16>
      %15 = vector.shape_cast %14 : vector<1x128x64xbf16> to vector<128x64xbf16>
      %cst = arith.constant dense<0.000000e+00> : vector<16x64xf32>
      %16 = tpu.matmul %13, %15, %cst {dimension_numbers = #tpu.dot_dimension_numbers<[1], [0], [0], [1], [0, 0, 1, 1], [], []>} : vector<16x128xbf16>, vector<128x64xbf16>, vector<16x64xf32> -> vector<16x64xf32>
      %17 = arith.index_cast %1 : i32 to index
      %c0_10 = arith.constant 0 : index
      %c0_11 = arith.constant 0 : index
      %18 = vector.load %arg8[%17, %c0_10, %c0_11] : memref<2x16x64xf32, #tpu.memory_space<vmem>>, vector<1x16x64xf32>
      %19 = vector.shape_cast %18 : vector<1x16x64xf32> to vector<16x64xf32>
      %20 = vector.shape_cast %16 : vector<16x64xf32> to vector<1x16x64xf32>
      tpu.vector_store %arg8[%17, %c0_10, %c0_11], %20 {strides = array<i32>} : memref<2x16x64xf32, #tpu.memory_space<vmem>>, vector<1x16x64xf32>,
      %c0_12 = arith.constant 0 : index
      %c0_13 = arith.constant 0 : index
      %21 = vector.load %arg9[%c0_12, %c0_13] : memref<16x1xf32, #tpu.memory_space<vmem>>, vector<16x1xf32>
      %cst_14 = arith.constant dense<0.000000e+00> : vector<16xf32>
      %22 = vector.multi_reduction <add>, %16, %cst_14 [1] : vector<16x64xf32> to vector<16xf32>
      %23 = vector.shape_cast %22 : vector<16xf32> to vector<16x1xf32>
      %24 = arith.addf %21, %23 : vector<16x1xf32>
      %c0_15 = arith.constant 0 : index
      %c0_16 = arith.constant 0 : index
      %25 = vector.load %arg9[%c0_15, %c0_16] : memref<16x1xf32, #tpu.memory_space<vmem>>, vector<16x1xf32>
      tpu.vector_store %arg9[%c0_15, %c0_16], %24 {strides = array<i32>} : memref<16x1xf32, #tpu.memory_space<vmem>>, vector<16x1xf32>,
      %c0_17 = arith.constant 0 : index
      %c0_18 = arith.constant 0 : index
      %26 = vector.load %arg10[%c0_17, %c0_18] : memref<16x1xf32, #tpu.memory_space<vmem>>, vector<16x1xf32>
      %27 = arith.mulf %16, %16 : vector<16x64xf32>
      %cst_19 = arith.constant dense<0.000000e+00> : vector<16xf32>
      %28 = vector.multi_reduction <add>, %27, %cst_19 [1] : vector<16x64xf32> to vector<16xf32>
      %29 = vector.shape_cast %28 : vector<16xf32> to vector<16x1xf32>
      %30 = arith.addf %26, %29 : vector<16x1xf32>
      %c0_20 = arith.constant 0 : index
      %c0_21 = arith.constant 0 : index
      %31 = vector.load %arg10[%c0_20, %c0_21] : memref<16x1xf32, #tpu.memory_space<vmem>>, vector<16x1xf32>
      tpu.vector_store %arg10[%c0_20, %c0_21], %30 {strides = array<i32>} : memref<16x1xf32, #tpu.memory_space<vmem>>, vector<16x1xf32>,
    } else {
    }
    %c1_i32_1 = arith.constant 1 : i32
    %5 = arith.cmpi eq, %arg0, %c1_i32_1 : i32
    %6 = arith.extui %5 : i1 to i32
    %c0_i32_2 = arith.constant 0 : i32
    %7 = arith.cmpi ne, %6, %c0_i32_2 : i32
    scf.if %7 {
      %c0_i32_3 = arith.constant 0 : i32
      %8 = arith.cmpi eq, %arg1, %c0_i32_3 : i32
      %c0_i32_4 = arith.constant 0 : i32
      %9 = arith.cmpi eq, %arg2, %c0_i32_4 : i32
      %10 = arith.andi %8, %9 : i1
      %11 = arith.extui %10 : i1 to i32
      %c0_i32_5 = arith.constant 0 : i32
      %12 = arith.cmpi ne, %11, %c0_i32_5 : i32
      scf.if %12 {
        %c0_14 = arith.constant 0 : index
        %c0_15 = arith.constant 0 : index
        %25 = vector.load %arg9[%c0_14, %c0_15] : memref<16x1xf32, #tpu.memory_space<vmem>>, vector<16x1xf32>
        %cst = arith.constant 1.280000e+02 : f32
        %26 = vector.broadcast %cst : f32 to vector<16x1xf32>
        %27 = arith.divf %25, %26 : vector<16x1xf32>
        %c0_16 = arith.constant 0 : index
        %c0_17 = arith.constant 0 : index
        %28 = vector.load %arg10[%c0_16, %c0_17] : memref<16x1xf32, #tpu.memory_space<vmem>>, vector<16x1xf32>
        %cst_18 = arith.constant 1.280000e+02 : f32
        %29 = vector.broadcast %cst_18 : f32 to vector<16x1xf32>
        %30 = arith.divf %28, %29 : vector<16x1xf32>
        %31 = arith.mulf %27, %27 : vector<16x1xf32>
        %32 = arith.subf %30, %31 : vector<16x1xf32>
        %cst_19 = arith.constant 0.000000e+00 : f32
        %33 = vector.broadcast %cst_19 : f32 to vector<16x1xf32>
        %34 = arith.maximumf %32, %33 : vector<16x1xf32>
        %cst_20 = arith.constant 9.99999974E-6 : f32
        %35 = vector.broadcast %cst_20 : f32 to vector<16x1xf32>
        %36 = arith.addf %34, %35 : vector<16x1xf32>
        %37 = math.rsqrt %36 : vector<16x1xf32>
        %c0_21 = arith.constant 0 : index
        %c0_22 = arith.constant 0 : index
        %38 = vector.load %arg5[%c0_21, %c0_22] : memref<16x1xf32, #tpu.memory_space<vmem>>, vector<16x1xf32>
        %39 = arith.mulf %38, %37 : vector<16x1xf32>
        %c0_23 = arith.constant 0 : index
        %c0_24 = arith.constant 0 : index
        %40 = vector.load %arg11[%c0_23, %c0_24] : memref<16x1xf32, #tpu.memory_space<vmem>>, vector<16x1xf32>
        tpu.vector_store %arg11[%c0_23, %c0_24], %39 {strides = array<i32>} : memref<16x1xf32, #tpu.memory_space<vmem>>, vector<16x1xf32>,
        %c0_25 = arith.constant 0 : index
        %c0_26 = arith.constant 0 : index
        %41 = vector.load %arg6[%c0_25, %c0_26] : memref<16x1xf32, #tpu.memory_space<vmem>>, vector<16x1xf32>
        %42 = arith.mulf %27, %38 : vector<16x1xf32>
        %43 = arith.mulf %42, %37 : vector<16x1xf32>
        %44 = arith.subf %41, %43 : vector<16x1xf32>
        %c0_27 = arith.constant 0 : index
        %c0_28 = arith.constant 0 : index
        %45 = vector.load %arg12[%c0_27, %c0_28] : memref<16x1xf32, #tpu.memory_space<vmem>>, vector<16x1xf32>
        tpu.vector_store %arg12[%c0_27, %c0_28], %44 {strides = array<i32>} : memref<16x1xf32, #tpu.memory_space<vmem>>, vector<16x1xf32>,
      } else {
      }
      %13 = arith.index_cast %1 : i32 to index
      %c0 = arith.constant 0 : index
      %c0_6 = arith.constant 0 : index
      %14 = vector.load %arg8[%13, %c0, %c0_6] : memref<2x16x64xf32, #tpu.memory_space<vmem>>, vector<1x16x64xf32>
      %15 = vector.shape_cast %14 : vector<1x16x64xf32> to vector<16x64xf32>
      %c0_7 = arith.constant 0 : index
      %c0_8 = arith.constant 0 : index
      %16 = vector.load %arg11[%c0_7, %c0_8] : memref<16x1xf32, #tpu.memory_space<vmem>>, vector<16x1xf32>
      %17 = vector.broadcast %16 : vector<16x1xf32> to vector<16x64xf32>
      %18 = arith.mulf %15, %17 : vector<16x64xf32>
      %c0_9 = arith.constant 0 : index
      %c0_10 = arith.constant 0 : index
      %19 = vector.load %arg12[%c0_9, %c0_10] : memref<16x1xf32, #tpu.memory_space<vmem>>, vector<16x1xf32>
      %20 = vector.broadcast %19 : vector<16x1xf32> to vector<16x64xf32>
      %21 = arith.addf %18, %20 : vector<16x64xf32>
      %c0_11 = arith.constant 0 : index
      %c0_12 = arith.constant 0 : index
      %c0_13 = arith.constant 0 : index
      %22 = vector.load %arg7[%c0_11, %c0_12, %c0_13] : memref<1x16x64xf32, #tpu.memory_space<vmem>>, vector<1x16x64xf32>
      %23 = vector.shape_cast %22 : vector<1x16x64xf32> to vector<16x64xf32>
      %24 = vector.shape_cast %21 : vector<16x64xf32> to vector<1x16x64xf32>
      tpu.vector_store %arg7[%c0_11, %c0_12, %c0_13], %24 {strides = array<i32>} : memref<1x16x64xf32, #tpu.memory_space<vmem>>, vector<1x16x64xf32>,
    } else {
    }
    return
  }
  func.func @transform_0(%arg0: i32, %arg1: i32, %arg2: i32) -> (i32, i32, i32) {
    %c1_i32 = arith.constant 1 : i32
    %0 = arith.subi %c1_i32, %arg0 : i32
    %1 = arith.muli %0, %arg1 : i32
    %c1_i32_0 = arith.constant 1 : i32
    %2 = arith.subi %c1_i32_0, %arg0 : i32
    %3 = arith.muli %2, %arg2 : i32
    %c0_i32 = arith.constant 0 : i32
    %c0_i32_1 = arith.constant 0 : i32
    return %1, %c0_i32, %3 : i32, i32, i32
  }
  func.func @transform_1(%arg0: i32, %arg1: i32, %arg2: i32) -> (i32, i32) {
    %c0_i32 = arith.constant 0 : i32
    %c0_i32_0 = arith.constant 0 : i32
    %c0_i32_1 = arith.constant 0 : i32
    return %c0_i32, %c0_i32_0 : i32, i32
  }
  func.func @transform_2(%arg0: i32, %arg1: i32, %arg2: i32) -> (i32, i32) {
    %c0_i32 = arith.constant 0 : i32
    %c0_i32_0 = arith.constant 0 : i32
    %c0_i32_1 = arith.constant 0 : i32
    return %c0_i32, %c0_i32_0 : i32, i32
  }
  func.func @transform_3(%arg0: i32, %arg1: i32, %arg2: i32) -> (i32, i32) {
    %c0_i32 = arith.constant 0 : i32
    %c0_i32_0 = arith.constant 0 : i32
    %c0_i32_1 = arith.constant 0 : i32
    return %c0_i32, %c0_i32_0 : i32, i32
  }
  func.func @transform_4(%arg0: i32, %arg1: i32, %arg2: i32) -> (i32, i32, i32) {
    %0 = arith.muli %arg0, %arg1 : i32
    %1 = arith.muli %arg0, %arg2 : i32
    %c0_i32 = arith.constant 0 : i32
    %c0_i32_0 = arith.constant 0 : i32
    return %0, %c0_i32, %1 : i32, i32, i32
  }
}

module attributes {stable_mosaic.version = 11 : i64} {
  func.func @_fused_conv_bn_kernel(%arg0: i32, %arg1: i32, %arg2: i32, %arg3: memref<1x64x128xbf16, #tpu.memory_space<vmem>>, %arg4: memref<8x64xbf16, #tpu.memory_space<vmem>>, %arg5: memref<8x1xf32, #tpu.memory_space<vmem>>, %arg6: memref<8x1xf32, #tpu.memory_space<vmem>>, %arg7: memref<1x8x128xf32, #tpu.memory_space<vmem>>, %arg8: memref<4x8x128xf32, #tpu.memory_space<vmem>>, %arg9: memref<8x1xf32, #tpu.memory_space<vmem>>, %arg10: memref<8x1xf32, #tpu.memory_space<vmem>>, %arg11: memref<8x1xf32, #tpu.memory_space<vmem>>, %arg12: memref<8x1xf32, #tpu.memory_space<vmem>>) attributes {dimension_semantics = [#tpu.dimension_semantics<arbitrary>, #tpu.dimension_semantics<arbitrary>, #tpu.dimension_semantics<arbitrary>], iteration_bounds = array<i64: 2, 2, 2>, scalar_prefetch = 0 : i64, scratch_operands = 5 : i64, tpu.core_type = #tpu.core_type<tc>, window_params = [{transform_indices = @transform_0, window_bounds = array<i64: 1, 64, 128>}, {pipeline_mode = #tpu.pipeline_mode<synchronous>, transform_indices = @transform_1, window_bounds = array<i64: 8, 64>}, {pipeline_mode = #tpu.pipeline_mode<synchronous>, transform_indices = @transform_2, window_bounds = array<i64: 8, 1>}, {pipeline_mode = #tpu.pipeline_mode<synchronous>, transform_indices = @transform_3, window_bounds = array<i64: 8, 1>}, {transform_indices = @transform_4, window_bounds = array<i64: 1, 8, 128>}]} {
    %c2_i32 = arith.constant 2 : i32
    %0 = arith.muli %arg1, %c2_i32 : i32
    %1 = arith.addi %0, %arg2 : i32
    %c0_i32 = arith.constant 0 : i32
    %2 = arith.cmpi eq, %arg0, %c0_i32 : i32
    %3 = arith.extui %2 : i1 to i32
    %c0_i32_0 = arith.constant 0 : i32
    %4 = arith.cmpi ne, %3, %c0_i32_0 : i32
    scf.if %4 {
      %c0_i32_2 = arith.constant 0 : i32
      %8 = arith.cmpi eq, %arg1, %c0_i32_2 : i32
      %c0_i32_3 = arith.constant 0 : i32
      %9 = arith.cmpi eq, %arg2, %c0_i32_3 : i32
      %10 = arith.andi %8, %9 : i1
      %11 = arith.extui %10 : i1 to i32
      %c0_i32_4 = arith.constant 0 : i32
      %12 = arith.cmpi ne, %11, %c0_i32_4 : i32
      scf.if %12 {
        %cst_21 = arith.constant 0.000000e+00 : f32
        %32 = vector.broadcast %cst_21 : f32 to vector<8x1xf32>
        %c0_22 = arith.constant 0 : index
        %c0_23 = arith.constant 0 : index
        %33 = vector.load %arg9[%c0_22, %c0_23] : memref<8x1xf32, #tpu.memory_space<vmem>>, vector<8x1xf32>
        tpu.vector_store %arg9[%c0_22, %c0_23], %32 {strides = array<i32>} : memref<8x1xf32, #tpu.memory_space<vmem>>, vector<8x1xf32>,
        %cst_24 = arith.constant 0.000000e+00 : f32
        %34 = vector.broadcast %cst_24 : f32 to vector<8x1xf32>
        %c0_25 = arith.constant 0 : index
        %c0_26 = arith.constant 0 : index
        %35 = vector.load %arg10[%c0_25, %c0_26] : memref<8x1xf32, #tpu.memory_space<vmem>>, vector<8x1xf32>
        tpu.vector_store %arg10[%c0_25, %c0_26], %34 {strides = array<i32>} : memref<8x1xf32, #tpu.memory_space<vmem>>, vector<8x1xf32>,
      } else {
      }
      %c0 = arith.constant 0 : index
      %c0_5 = arith.constant 0 : index
      %13 = vector.load %arg4[%c0, %c0_5] : memref<8x64xbf16, #tpu.memory_space<vmem>>, vector<8x64xbf16>
      %c0_6 = arith.constant 0 : index
      %c0_7 = arith.constant 0 : index
      %c0_8 = arith.constant 0 : index
      %14 = vector.load %arg3[%c0_6, %c0_7, %c0_8] : memref<1x64x128xbf16, #tpu.memory_space<vmem>>, vector<1x64x128xbf16>
      %15 = vector.shape_cast %14 : vector<1x64x128xbf16> to vector<64x128xbf16>
      %cst = arith.constant dense<0.000000e+00> : vector<8x128xf32>
      %16 = tpu.matmul %13, %15, %cst {dimension_numbers = #tpu.dot_dimension_numbers<[1], [0], [0], [1], [0, 0, 1, 1], [], []>} : vector<8x64xbf16>, vector<64x128xbf16>, vector<8x128xf32> -> vector<8x128xf32>
      %17 = arith.index_cast %1 : i32 to index
      %c0_9 = arith.constant 0 : index
      %c0_10 = arith.constant 0 : index
      %18 = vector.load %arg8[%17, %c0_9, %c0_10] : memref<4x8x128xf32, #tpu.memory_space<vmem>>, vector<1x8x128xf32>
      %19 = vector.shape_cast %18 : vector<1x8x128xf32> to vector<8x128xf32>
      %20 = vector.shape_cast %16 : vector<8x128xf32> to vector<1x8x128xf32>
      tpu.vector_store %arg8[%17, %c0_9, %c0_10], %20 {strides = array<i32>} : memref<4x8x128xf32, #tpu.memory_space<vmem>>, vector<1x8x128xf32>,
      %c0_11 = arith.constant 0 : index
      %c0_12 = arith.constant 0 : index
      %21 = vector.load %arg9[%c0_11, %c0_12] : memref<8x1xf32, #tpu.memory_space<vmem>>, vector<8x1xf32>
      %cst_13 = arith.constant dense<0.000000e+00> : vector<8xf32>
      %22 = vector.multi_reduction <add>, %16, %cst_13 [1] : vector<8x128xf32> to vector<8xf32>
      %23 = vector.shape_cast %22 : vector<8xf32> to vector<8x1xf32>
      %24 = arith.addf %21, %23 : vector<8x1xf32>
      %c0_14 = arith.constant 0 : index
      %c0_15 = arith.constant 0 : index
      %25 = vector.load %arg9[%c0_14, %c0_15] : memref<8x1xf32, #tpu.memory_space<vmem>>, vector<8x1xf32>
      tpu.vector_store %arg9[%c0_14, %c0_15], %24 {strides = array<i32>} : memref<8x1xf32, #tpu.memory_space<vmem>>, vector<8x1xf32>,
      %c0_16 = arith.constant 0 : index
      %c0_17 = arith.constant 0 : index
      %26 = vector.load %arg10[%c0_16, %c0_17] : memref<8x1xf32, #tpu.memory_space<vmem>>, vector<8x1xf32>
      %27 = arith.mulf %16, %16 : vector<8x128xf32>
      %cst_18 = arith.constant dense<0.000000e+00> : vector<8xf32>
      %28 = vector.multi_reduction <add>, %27, %cst_18 [1] : vector<8x128xf32> to vector<8xf32>
      %29 = vector.shape_cast %28 : vector<8xf32> to vector<8x1xf32>
      %30 = arith.addf %26, %29 : vector<8x1xf32>
      %c0_19 = arith.constant 0 : index
      %c0_20 = arith.constant 0 : index
      %31 = vector.load %arg10[%c0_19, %c0_20] : memref<8x1xf32, #tpu.memory_space<vmem>>, vector<8x1xf32>
      tpu.vector_store %arg10[%c0_19, %c0_20], %30 {strides = array<i32>} : memref<8x1xf32, #tpu.memory_space<vmem>>, vector<8x1xf32>,
    } else {
    }
    %c1_i32 = arith.constant 1 : i32
    %5 = arith.cmpi eq, %arg0, %c1_i32 : i32
    %6 = arith.extui %5 : i1 to i32
    %c0_i32_1 = arith.constant 0 : i32
    %7 = arith.cmpi ne, %6, %c0_i32_1 : i32
    scf.if %7 {
      %c0_i32_2 = arith.constant 0 : i32
      %8 = arith.cmpi eq, %arg1, %c0_i32_2 : i32
      %c0_i32_3 = arith.constant 0 : i32
      %9 = arith.cmpi eq, %arg2, %c0_i32_3 : i32
      %10 = arith.andi %8, %9 : i1
      %11 = arith.extui %10 : i1 to i32
      %c0_i32_4 = arith.constant 0 : i32
      %12 = arith.cmpi ne, %11, %c0_i32_4 : i32
      scf.if %12 {
        %c0_13 = arith.constant 0 : index
        %c0_14 = arith.constant 0 : index
        %25 = vector.load %arg9[%c0_13, %c0_14] : memref<8x1xf32, #tpu.memory_space<vmem>>, vector<8x1xf32>
        %cst = arith.constant 5.120000e+02 : f32
        %26 = vector.broadcast %cst : f32 to vector<8x1xf32>
        %27 = arith.divf %25, %26 : vector<8x1xf32>
        %c0_15 = arith.constant 0 : index
        %c0_16 = arith.constant 0 : index
        %28 = vector.load %arg10[%c0_15, %c0_16] : memref<8x1xf32, #tpu.memory_space<vmem>>, vector<8x1xf32>
        %cst_17 = arith.constant 5.120000e+02 : f32
        %29 = vector.broadcast %cst_17 : f32 to vector<8x1xf32>
        %30 = arith.divf %28, %29 : vector<8x1xf32>
        %31 = arith.mulf %27, %27 : vector<8x1xf32>
        %32 = arith.subf %30, %31 : vector<8x1xf32>
        %cst_18 = arith.constant 0.000000e+00 : f32
        %33 = vector.broadcast %cst_18 : f32 to vector<8x1xf32>
        %34 = arith.maximumf %32, %33 : vector<8x1xf32>
        %cst_19 = arith.constant 9.99999974E-6 : f32
        %35 = vector.broadcast %cst_19 : f32 to vector<8x1xf32>
        %36 = arith.addf %34, %35 : vector<8x1xf32>
        %37 = math.rsqrt %36 : vector<8x1xf32>
        %c0_20 = arith.constant 0 : index
        %c0_21 = arith.constant 0 : index
        %38 = vector.load %arg5[%c0_20, %c0_21] : memref<8x1xf32, #tpu.memory_space<vmem>>, vector<8x1xf32>
        %39 = arith.mulf %38, %37 : vector<8x1xf32>
        %c0_22 = arith.constant 0 : index
        %c0_23 = arith.constant 0 : index
        %40 = vector.load %arg11[%c0_22, %c0_23] : memref<8x1xf32, #tpu.memory_space<vmem>>, vector<8x1xf32>
        tpu.vector_store %arg11[%c0_22, %c0_23], %39 {strides = array<i32>} : memref<8x1xf32, #tpu.memory_space<vmem>>, vector<8x1xf32>,
        %c0_24 = arith.constant 0 : index
        %c0_25 = arith.constant 0 : index
        %41 = vector.load %arg6[%c0_24, %c0_25] : memref<8x1xf32, #tpu.memory_space<vmem>>, vector<8x1xf32>
        %42 = arith.mulf %27, %38 : vector<8x1xf32>
        %43 = arith.mulf %42, %37 : vector<8x1xf32>
        %44 = arith.subf %41, %43 : vector<8x1xf32>
        %c0_26 = arith.constant 0 : index
        %c0_27 = arith.constant 0 : index
        %45 = vector.load %arg12[%c0_26, %c0_27] : memref<8x1xf32, #tpu.memory_space<vmem>>, vector<8x1xf32>
        tpu.vector_store %arg12[%c0_26, %c0_27], %44 {strides = array<i32>} : memref<8x1xf32, #tpu.memory_space<vmem>>, vector<8x1xf32>,
      } else {
      }
      %13 = arith.index_cast %1 : i32 to index
      %c0 = arith.constant 0 : index
      %c0_5 = arith.constant 0 : index
      %14 = vector.load %arg8[%13, %c0, %c0_5] : memref<4x8x128xf32, #tpu.memory_space<vmem>>, vector<1x8x128xf32>
      %15 = vector.shape_cast %14 : vector<1x8x128xf32> to vector<8x128xf32>
      %c0_6 = arith.constant 0 : index
      %c0_7 = arith.constant 0 : index
      %16 = vector.load %arg11[%c0_6, %c0_7] : memref<8x1xf32, #tpu.memory_space<vmem>>, vector<8x1xf32>
      %17 = vector.broadcast %16 : vector<8x1xf32> to vector<8x128xf32>
      %18 = arith.mulf %15, %17 : vector<8x128xf32>
      %c0_8 = arith.constant 0 : index
      %c0_9 = arith.constant 0 : index
      %19 = vector.load %arg12[%c0_8, %c0_9] : memref<8x1xf32, #tpu.memory_space<vmem>>, vector<8x1xf32>
      %20 = vector.broadcast %19 : vector<8x1xf32> to vector<8x128xf32>
      %21 = arith.addf %18, %20 : vector<8x128xf32>
      %c0_10 = arith.constant 0 : index
      %c0_11 = arith.constant 0 : index
      %c0_12 = arith.constant 0 : index
      %22 = vector.load %arg7[%c0_10, %c0_11, %c0_12] : memref<1x8x128xf32, #tpu.memory_space<vmem>>, vector<1x8x128xf32>
      %23 = vector.shape_cast %22 : vector<1x8x128xf32> to vector<8x128xf32>
      %24 = vector.shape_cast %21 : vector<8x128xf32> to vector<1x8x128xf32>
      tpu.vector_store %arg7[%c0_10, %c0_11, %c0_12], %24 {strides = array<i32>} : memref<1x8x128xf32, #tpu.memory_space<vmem>>, vector<1x8x128xf32>,
    } else {
    }
    return
  }
  func.func @transform_0(%arg0: i32, %arg1: i32, %arg2: i32) -> (i32, i32, i32) {
    %c1_i32 = arith.constant 1 : i32
    %0 = arith.subi %c1_i32, %arg0 : i32
    %1 = arith.muli %0, %arg1 : i32
    %c1_i32_0 = arith.constant 1 : i32
    %2 = arith.subi %c1_i32_0, %arg0 : i32
    %3 = arith.muli %2, %arg2 : i32
    %c0_i32 = arith.constant 0 : i32
    %c0_i32_1 = arith.constant 0 : i32
    return %1, %c0_i32, %3 : i32, i32, i32
  }
  func.func @transform_1(%arg0: i32, %arg1: i32, %arg2: i32) -> (i32, i32) {
    %c0_i32 = arith.constant 0 : i32
    %c0_i32_0 = arith.constant 0 : i32
    %c0_i32_1 = arith.constant 0 : i32
    return %c0_i32, %c0_i32_0 : i32, i32
  }
  func.func @transform_2(%arg0: i32, %arg1: i32, %arg2: i32) -> (i32, i32) {
    %c0_i32 = arith.constant 0 : i32
    %c0_i32_0 = arith.constant 0 : i32
    %c0_i32_1 = arith.constant 0 : i32
    return %c0_i32, %c0_i32_0 : i32, i32
  }
  func.func @transform_3(%arg0: i32, %arg1: i32, %arg2: i32) -> (i32, i32) {
    %c0_i32 = arith.constant 0 : i32
    %c0_i32_0 = arith.constant 0 : i32
    %c0_i32_1 = arith.constant 0 : i32
    return %c0_i32, %c0_i32_0 : i32, i32
  }
  func.func @transform_4(%arg0: i32, %arg1: i32, %arg2: i32) -> (i32, i32, i32) {
    %0 = arith.muli %arg0, %arg1 : i32
    %1 = arith.muli %arg0, %arg2 : i32
    %c0_i32 = arith.constant 0 : i32
    %c0_i32_0 = arith.constant 0 : i32
    return %0, %c0_i32, %1 : i32, i32, i32
  }
}

</mosaic_0001>

<bundles_post_ra>
// kernel: feature_extractor_forward.5
= control target key start
LH: loop header
LB: loop body
LE: loop exit
PB: predicated region body
PF: predicated region fallthrough
CT: control target
= control target key end

     0   :  { %s1024_s15 = smov 0   ;;  %s1026_s16 = smov 0   ;;  %s1177_s0 = inlined_call_operand.vmem [shape: bf16[2,256,16], index: 0, kind: input, shape index: {}]   ;;  %s1178_s1 = inlined_call_operand.vmem [shape: bf16[32,256], index: 1, kind: input, shape index: {}]   ;;  %s1179_s2 = inlined_call_operand.vmem [shape: f32[32,1], index: 2, kind: input, shape index: {}]   ;;  %s1180_s3 = inlined_call_operand.vmem [shape: f32[32,1], index: 3, kind: input, shape index: {}]   ;;  %s1181_s4 = inlined_call_operand.vmem [shape: f32[2,32,16], index: 4, kind: output, shape index: {}]  }
   0x1   :  { %s1028_s17 = smov 0   ;;  %s1030_s18 = smov 0  }
   0x2   :  { %s1032_s19 = smov 0  }
   0x3 LB: > { %s29_s20 = sadd.s32 1, %s987_s17  ;;  %s33_s21 = sadd.s32 1, %s991_s18  ;;  %s995_s19 = sphi %s1032_s19, %s14_s19   ;;  %s991_s18 = sphi %s1030_s18, %s1185_s18   ;;  %s987_s17 = sphi %s1028_s17, %s1184_s17   ;;  %s983_s16 = sphi %s1026_s16, %s1183_s16   ;;  %s979_s15 = sphi %s1024_s15, %s1182_s15  }
   0x4   : > { %p31_p0 = scmp.ge.s32.totalorder %s29_s20, 2  ;;  %p802_p1 = scmp.ge.s32.totalorder %s995_s19, 1 }
   0x5   : > { %p204_p2 = scmp.lt.s32.totalorder %s995_s19, 5 }
   0x6   : > { %s1187_s20 = smov (%p31_p0, %s29_s20), 0  ;;  %s1189_s21 = smov (!%p31_p0, %s33_s21), %s991_s18 }
   0x7   : > { %p205_p3 = pnand %p802_p1, %p204_p2  ;;  %p35_p4 = scmp.ge.s32.totalorder %s1189_s21, 2 }
   0x8   : > { %s241_s22 = ssub.s32 (!%p205_p3), 1, %s983_s16  ;;  %s255_s23 = smul.u32 (!%p205_p3), %s979_s15, %s983_s16 }
   0x9   : > { %s1191_s21 = smov (%p35_p4, %s1189_s21), 0  ;;  %208 = sbr.rel (%p205_p3) target bundleno = 625 (0x271), region = 36 }
   0xa   : > { %s242_s24 = smul.u32 (!%p205_p3), %s979_s15, %s241_s22  ;;  %p257_p5 = scmp.lt.s32.totalorder (!%p205_p3), %s255_s23, 1 }
   0xb   : > { %p807_p7 = scmp.ne.s32.totalorder (!%p205_p3), %s983_s16, 0 }
   0xc   : > { %p244_p6 = scmp.lt.s32.totalorder (!%p205_p3), %s242_s24, 1 }
  0x10   : > { %s1193_s23 = smov (!%p257_p5, %s255_s23), 1  ;;  %s1195_s24 = smov (!%p244_p6, %s242_s24), 1 }
  0x11   : > { %s836_s25 = sshll.u32 %s1193_s23, 5  ;;  %s835_s26 = sshll.u32 %s1195_s24, 7 }
  0x12   : > { %s1065_s29 = scalar_lea.vmem %s1181_s4, %s836_s25  ;;  %s1070_s6 = scalar_lea.vmem %s1177_s0, %s835_s26 }
  0x13   : > { %272 = sbr.rel (%p807_p7) target bundleno = 439 (0x1b7), region = 40  ;;  %p273_p8 = scmp.eq.s32.totalorder (!%p807_p7), %s979_s15, 0 }
  0x1a   : > { %278 = sbr.rel (!%p273_p8) target bundleno = 33 (0x21), region = 44  ;;  %vm279_vm0 = vcmask (%p273_p8), 7168   ;;  %v997_v0 = vmov (%p273_p8), 0.0  }
  0x1b   : > { %280 = vst.msk [vmem:[#allocation3] sm:$0xff] (%p273_p8), %vm279_vm0, %v997_v0  ;;  %281 = vst.msk [vmem:[#allocation3 + $0x8] sm:$0xff] (%p273_p8), %vm279_vm0, %v997_v0 }
  0x1c   : > { %282 = vst.msk [vmem:[#allocation3 + $0x10] sm:$0xff] (%p273_p8), %vm279_vm0, %v997_v0  ;;  %283 = vst.msk [vmem:[#allocation3 + $0x18] sm:$0xff] (%p273_p8), %vm279_vm0, %v997_v0 }
  0x1d   : > { %284 = vst.msk [vmem:[#allocation4] sm:$0xff] (%p273_p8), %vm279_vm0, %v997_v0  ;;  %285 = vst.msk [vmem:[#allocation4 + $0x8] sm:$0xff] (%p273_p8), %vm279_vm0, %v997_v0 }
  0x1e   : > { %286 = vst.msk [vmem:[#allocation4 + $0x10] sm:$0xff] (%p273_p8), %vm279_vm0, %v997_v0  ;;  %287 = vst.msk [vmem:[#allocation4 + $0x18] sm:$0xff] (%p273_p8), %vm279_vm0, %v997_v0 }
  0x21 PF: > { %v925_v1 = vld [vmem:[%s1070_s6 + $0x40] sm:$0xff]   ;;  %v927_v3 = vld [vmem:[%s1070_s6 + $0x48] sm:$0xff]   ;;  %v929_v5 = vld [vmem:[%s1070_s6 + $0x50] sm:$0xff]   ;;  %s829_s22 = sshll.u32 %s979_s15, 5  ;;  %vm491_vm1 = vcmask 130048   ;;  %vm516_vm2 = vcmask 7168  }
  0x22   : > { %v926_v2 = vld [vmem:[%s1070_s6] sm:$0xff]   ;;  %839 = vmatprep.subr.bf16.mxu0 %v925_v1  ;;  %867 = vmatprep.subr.bf16.mxu1 %v925_v1  ;;  %v928_v4 = vld [vmem:[%s1070_s6 + $0x8] sm:$0xff]   ;;  %v930_v6 = vld [vmem:[%s1070_s6 + $0x10] sm:$0xff]   ;;  %s490_s23 = scalar_lea.vmem [#allocation2], %s829_s22 }
  0x23   : > { %840 = vmatpush3.bf16.msra.mxu0 %v926_v2  ;;  %875 = vmatpush3.bf16.msra.mxu1 %v926_v2  ;;  %v931_v7 = vld [vmem:[%s1070_s6 + $0x58] sm:$0xff]   ;;  %v933_v9 = vld [vmem:[%s1070_s6 + $0x60] sm:$0xff]   ;;  %v935_v11 = vld [vmem:[%s1070_s6 + $0x68] sm:$0xff]  }
  0x24   : > { %841 = vmatprep.subr.bf16.mxu0 %v927_v3  ;;  %868 = vmatprep.subr.bf16.mxu1 %v927_v3  ;;  %v932_v8 = vld [vmem:[%s1070_s6 + $0x18] sm:$0xff]   ;;  %v934_v10 = vld [vmem:[%s1070_s6 + $0x20] sm:$0xff]   ;;  %v936_v14 = vld [vmem:[%s1070_s6 + $0x28] sm:$0xff]  }
  0x25   : > { %v943_v12 = vld [vmem:[%s1178_s1 + $0x4] ss:$8 sps:$4 sm:$0xff]   ;;  %v946_v13 = vld [vmem:[%s1178_s1 + $0x14] ss:$8 sps:$4 sm:$0xff]   ;;  %v941_v19 = vld [vmem:[%s1178_s1] ss:$8 sps:$4 sm:$0xff]  }
  0x26   : > { %v937_v15 = vld [vmem:[%s1070_s6 + $0x70] sm:$0xff]   ;;  %472 = vmatprep.mubr.bf16.mxu0 %v943_v12  ;;  %480 = vmatprep.mubr.bf16.mxu1 %v946_v13  ;;  %v939_v17 = vld [vmem:[%s1070_s6 + $0x78] sm:$0xff]   ;;  %v496_v46 = vld [vmem:[#allocation3] sm:$0xff] }
  0x27   : > { %842 = vmatpush3.bf16.msra.mxu0 %v928_v4  ;;  %876 = vmatpush3.bf16.msra.mxu1 %v928_v4  ;;  %v938_v16 = vld [vmem:[%s1070_s6 + $0x30] sm:$0xff]   ;;  %v940_v18 = vld [vmem:[%s1070_s6 + $0x38] sm:$0xff]   ;;  %v497_v52 = vld [vmem:[#allocation3 + $0x8] sm:$0xff] }
  0x28   : > { %843 = vmatprep.subr.bf16.mxu0 %v929_v5  ;;  %869 = vmatprep.subr.bf16.mxu1 %v929_v5  ;;  %v944_v20 = vld [vmem:[%s1178_s1 + $0x10] ss:$8 sps:$4 sm:$0xff]   ;;  %v522_v57 = vld [vmem:[#allocation4 + $0x8] sm:$0xff]  ;;  %v521_v58 = vld [vmem:[#allocation4] sm:$0xff] }
  0x29   : > { %v498_v45 = vld [vmem:[#allocation3 + $0x10] sm:$0xff]  ;;  %v499_v51 = vld [vmem:[#allocation3 + $0x18] sm:$0xff] }
  0x2a   : > { %v524_v63 = vld [vmem:[#allocation4 + $0x18] sm:$0xff]  ;;  %v523_v0 = vld [vmem:[#allocation4 + $0x10] sm:$0xff] }
  0x2b   : > { %844 = vmatpush3.bf16.msra.mxu0 %v930_v6  ;;  %877 = vmatpush3.bf16.msra.mxu1 %v930_v6 }
  0x2c   : > { %845 = vmatprep.subr.bf16.mxu0 %v931_v7  ;;  %870 = vmatprep.subr.bf16.mxu1 %v931_v7 }
  0x2f   : > { %846 = vmatpush3.bf16.msra.mxu0 %v932_v8  ;;  %878 = vmatpush3.bf16.msra.mxu1 %v932_v8 }
  0x30   : > { %847 = vmatprep.subr.bf16.mxu0 %v933_v9  ;;  %871 = vmatprep.subr.bf16.mxu1 %v933_v9 }
  0x33   : > { %848 = vmatpush3.bf16.msra.mxu0 %v934_v10  ;;  %879 = vmatpush3.bf16.msra.mxu1 %v934_v10 }
  0x34   : > { %849 = vmatprep.subr.bf16.mxu0 %v935_v11  ;;  %872 = vmatprep.subr.bf16.mxu1 %v935_v11 }
  0x37   : > { %850 = vmatpush3.bf16.msra.mxu0 %v936_v14  ;;  %880 = vmatpush3.bf16.msra.mxu1 %v936_v14 }
  0x38   : > { %851 = vmatprep.subr.bf16.mxu0 %v937_v15  ;;  %873 = vmatprep.subr.bf16.mxu1 %v937_v15 }
  0x3b   : > { %852 = vmatpush3.bf16.msra.mxu0 %v938_v16  ;;  %881 = vmatpush3.bf16.msra.mxu1 %v938_v16 }
  0x3c   : > { %853 = vmatprep.subr.bf16.mxu0 %v939_v17  ;;  %874 = vmatprep.subr.bf16.mxu1 %v939_v17 }
  0x3f   : > { %854 = vmatpush3.bf16.msra.mxu0 %v940_v18  ;;  %882 = vmatpush3.bf16.msra.mxu1 %v940_v18 }
  0x42   : > { %473 = vmatmul.mubr.bf16.vlgmr.msra.gmra.mrb[0].mxu0 %v941_v19  ;;  %481 = vmatmul.mubr.bf16.vlgmr.msra.gmra.mrb[0].mxu1 %v944_v20 }
 0x115   : > { %v855_v21 = vpop.f32.mrb[0].mxu0  ;;  %v861_v22 = vpop.f32.mrb[0].mxu1 }
 0x116   : > { %v856_v23 = vpop.f32.mrb[1].mxu0  ;;  %v862_v24 = vpop.f32.mrb[1].mxu1 }
 0x117   : > { %v857_v25 = vadd.f32 %v856_v23, %v855_v21  ;;  %v863_v26 = vadd.f32 %v862_v24, %v861_v22  ;;  %v858_v27 = vpop.f32.mrb[2].mxu0  ;;  %v864_v28 = vpop.f32.mrb[2].mxu1 }
 0x118   : > { %v859_v29 = vpop.f32.mrb[3].mxu0  ;;  %v865_v30 = vpop.f32.mrb[3].mxu1 }
 0x119   : > { %492 = vst.msk [vmem:[%s490_s23] sm:$0xff] %vm491_vm1, %v857_v25  ;;  %494 = vst.msk [vmem:[%s490_s23 + $0x10] sm:$0xff] %vm491_vm1, %v863_v26  ;;  %v860_v31 = vadd.f32 %v859_v29, %v858_v27  ;;  %v866_v32 = vadd.f32 %v865_v30, %v864_v28  ;;  %v506_v33 = vsel %vm491_vm1, %v863_v26, 0.0  ;;  %v500_v34 = vsel %vm491_vm1, %v857_v25, 0.0 }
 0x11a   : > { %507 = vadd.xlane.f32.xlu1 %v506_v33  ;;  %501 = vadd.xlane.f32.xlu0 %v500_v34  ;;  %v525_v38 = vmul.f32 %v857_v25, %v857_v25  ;;  %v527_v42 = vmul.f32 %v863_v26, %v863_v26 }
 0x11b   : > { %493 = vst.msk [vmem:[%s490_s23 + $0x8] sm:$0xff] %vm491_vm1, %v860_v31  ;;  %495 = vst.msk [vmem:[%s490_s23 + $0x18] sm:$0xff] %vm491_vm1, %v866_v32  ;;  %v509_v35 = vsel %vm491_vm1, %v866_v32, 0.0  ;;  %v503_v36 = vsel %vm491_vm1, %v860_v31, 0.0  ;;  %v526_v37 = vmul.f32 %v860_v31, %v860_v31  ;;  %v528_v41 = vmul.f32 %v866_v32, %v866_v32 }
 0x11c   : > { %v529_v40 = vsel %vm491_vm1, %v525_v38, 0.0  ;;  %v535_v44 = vsel %vm491_vm1, %v527_v42, 0.0 }
 0x11d   : > { %v532_v39 = vsel %vm491_vm1, %v526_v37, 0.0  ;;  %v538_v43 = vsel %vm491_vm1, %v528_v41, 0.0 }
 0x11e   : > { %510 = vadd.xlane.f32.xlu1 %v509_v35  ;;  %504 = vadd.xlane.f32.xlu0 %v503_v36 }
 0x122   : > { %533 = vadd.xlane.f32.xlu1 %v532_v39  ;;  %530 = vadd.xlane.f32.xlu0 %v529_v40 }
 0x126   : > { %539 = vadd.xlane.f32.xlu1 %v538_v43  ;;  %536 = vadd.xlane.f32.xlu0 %v535_v44 }
 0x1a7   : > { %v508_v47 = vpop.xlane.xlu1 %507  ;;  %v502_v48 = vpop.xlane.xlu0 %501 }
 0x1a8   : > { %v514_v49 = vadd.f32 %v508_v47, %v498_v45  ;;  %v512_v50 = vadd.f32 %v502_v48, %v496_v46 }
 0x1aa   : > { %519 = vst.msk [vmem:[#allocation3 + $0x10] sm:$0xff] %vm516_vm2, %v514_v49  ;;  %517 = vst.msk [vmem:[#allocation3] sm:$0xff] %vm516_vm2, %v512_v50 }
 0x1ab   : > { %v511_v53 = vpop.xlane.xlu1 %510  ;;  %v505_v54 = vpop.xlane.xlu0 %504 }
 0x1ac   : > { %v515_v55 = vadd.f32 %v511_v53, %v499_v51  ;;  %v513_v56 = vadd.f32 %v505_v54, %v497_v52 }
 0x1ae   : > { %520 = vst.msk [vmem:[#allocation3 + $0x18] sm:$0xff] %vm516_vm2, %v515_v55  ;;  %518 = vst.msk [vmem:[#allocation3 + $0x8] sm:$0xff] %vm516_vm2, %v513_v56 }
 0x1af   : > { %v534_v59 = vpop.xlane.xlu1 %533  ;;  %v531_v60 = vpop.xlane.xlu0 %530 }
 0x1b0   : > { %v542_v61 = vadd.f32 %v534_v59, %v522_v57  ;;  %v541_v62 = vadd.f32 %v531_v60, %v521_v58 }
 0x1b2   : > { %546 = vst.msk [vmem:[#allocation4 + $0x8] sm:$0xff] %vm516_vm2, %v542_v61  ;;  %545 = vst.msk [vmem:[#allocation4] sm:$0xff] %vm516_vm2, %v541_v62 }
 0x1b3   : > { %v540_v1 = vpop.xlane.xlu1 %539  ;;  %v537_v2 = vpop.xlane.xlu0 %536 }
 0x1b4   : > { %v544_v3 = vadd.f32 %v540_v1, %v524_v63  ;;  %v543_v4 = vadd.f32 %v537_v2, %v523_v0 }
 0x1b6   : > { %548 = vst.msk [vmem:[#allocation4 + $0x18] sm:$0xff] %vm516_vm2, %v544_v3  ;;  %547 = vst.msk [vmem:[#allocation4 + $0x10] sm:$0xff] %vm516_vm2, %v543_v4 }
 0x1b7 PF: > { %p830_p9 = scmp.ne.s32.totalorder %s983_s16, 1 }
 0x1b8   : > { %p553_p10 = scmp.eq.s32.totalorder (!%p830_p9), %s979_s15, 0 }
 0x1b9   : > { %552 = sbr.rel (%p830_p9) target bundleno = 625 (0x271), region = 48 }
 0x1c0   : > { %558 = sbr.rel (!%p553_p10) target bundleno = 478 (0x1de), region = 52  ;;  %v559_v5 = vld [vmem:[#allocation3] sm:$0xff] (%p553_p10)  ;;  %v560_v9 = vld [vmem:[#allocation3 + $0x8] sm:$0xff] (%p553_p10)  ;;  %v561_v13 = vld [vmem:[#allocation3 + $0x10] sm:$0xff] (%p553_p10)  ;;  %vm604_vm3 = vcmask (%p553_p10), 7168  }
 0x1c1   : > { %v568_v6 = vld [vmem:[#allocation4] sm:$0xff] (%p553_p10)  ;;  %v564_v7 = vmul.f32 (%p553_p10), 0.03125, %v559_v5  ;;  %v569_v10 = vld [vmem:[#allocation4 + $0x8] sm:$0xff] (%p553_p10)  ;;  %v565_v11 = vmul.f32 (%p553_p10), 0.03125, %v560_v9  ;;  %v570_v14 = vld [vmem:[#allocation4 + $0x10] sm:$0xff] (%p553_p10)  ;;  %v566_v16 = vmul.f32 (%p553_p10), 0.03125, %v561_v13 }
 0x1c2   : > { %v572_v8 = vmul.f32 (%p553_p10), 0.03125, %v568_v6  ;;  %v573_v12 = vmul.f32 (%p553_p10), 0.03125, %v569_v10  ;;  %v574_v17 = vmul.f32 (%p553_p10), 0.03125, %v570_v14  ;;  %v562_v18 = vld [vmem:[#allocation3 + $0x18] sm:$0xff] (%p553_p10)  ;;  %v596_v37 = vld [vmem:[%s1179_s2] sm:$0xff] (%p553_p10)  ;;  %v597_v38 = vld [vmem:[%s1179_s2 + $0x8] sm:$0xff] (%p553_p10) }
 0x1c3   : > { %v576_v15 = vmul.f32 (%p553_p10), %v564_v7, %v564_v7  ;;  %v571_v19 = vld [vmem:[#allocation4 + $0x18] sm:$0xff] (%p553_p10)  ;;  %v577_v20 = vmul.f32 (%p553_p10), %v565_v11, %v565_v11  ;;  %v567_v21 = vmul.f32 (%p553_p10), 0.03125, %v562_v18  ;;  %v578_v24 = vmul.f32 (%p553_p10), %v566_v16, %v566_v16  ;;  %v598_v39 = vld [vmem:[%s1179_s2 + $0x10] sm:$0xff] (%p553_p10)  ;;  %v609_v46 = vld [vmem:[%s1180_s3] sm:$0xff] (%p553_p10) }
 0x1c4   : > { %v575_v22 = vmul.f32 (%p553_p10), 0.03125, %v571_v19  ;;  %v613_v40 = vmul.f32 (%p553_p10), %v596_v37, %v564_v7  ;;  %v599_v41 = vld [vmem:[%s1179_s2 + $0x18] sm:$0xff] (%p553_p10)  ;;  %v614_v42 = vmul.f32 (%p553_p10), %v597_v38, %v565_v11  ;;  %v615_v43 = vmul.f32 (%p553_p10), %v598_v39, %v566_v16  ;;  %v610_v50 = vld [vmem:[%s1180_s3 + $0x8] sm:$0xff] (%p553_p10)  ;;  %v611_v54 = vld [vmem:[%s1180_s3 + $0x10] sm:$0xff] (%p553_p10) }
 0x1c5   : > { %v580_v23 = vsub.f32 (%p553_p10), %v572_v8, %v576_v15  ;;  %v581_v25 = vsub.f32 (%p553_p10), %v573_v12, %v577_v20  ;;  %v579_v26 = vmul.f32 (%p553_p10), %v567_v21, %v567_v21  ;;  %v582_v28 = vsub.f32 (%p553_p10), %v574_v17, %v578_v24  ;;  %v612_v59 = vld [vmem:[%s1180_s3 + $0x18] sm:$0xff] (%p553_p10) }
 0x1c6   : > { %v616_v45 = vmul.f32 (%p553_p10), %v599_v41, %v567_v21 }
 0x1c7   : > { %v584_v27 = vmax.f32 %v580_v23, 0.0  ;;  %v585_v29 = vmax.f32 %v581_v25, 0.0  ;;  %v583_v30 = vsub.f32 %v575_v22, %v579_v26  ;;  %v586_v32 = vmax.f32 %v582_v28, 0.0 }
 0x1c9   : > { %v588_v31 = vadd.f32 1e-05, %v584_v27  ;;  %v589_v33 = vadd.f32 1e-05, %v585_v29  ;;  %v587_v34 = vmax.f32 %v583_v30, 0.0 }
 0x1ca   : > { %v590_v35 = vadd.f32 1e-05, %v586_v32 }
 0x1cb   : > { %947 = vrsqrt.f32 %v588_v31  ;;  %v591_v36 = vadd.f32 1e-05, %v587_v34 }
 0x1cc   : > { %949 = vrsqrt.f32 %v589_v33 }
 0x1cd   : > { %951 = vrsqrt.f32 %v590_v35 }
 0x1ce   : > { %953 = vrsqrt.f32 %v591_v36 }
 0x1d5   : > { %v948_v44 = vpop.eup %947 }
 0x1d6   : > { %v950_v47 = vpop.eup %949  ;;  %v600_v48 = vmul.f32 %v948_v44, %v596_v37  ;;  %v617_v49 = vmul.f32 %v948_v44, %v613_v40 }
 0x1d7   : > { %v952_v51 = vpop.eup %951  ;;  %v601_v52 = vmul.f32 %v950_v47, %v597_v38  ;;  %v618_v53 = vmul.f32 %v950_v47, %v614_v42 }
 0x1d8   : > { %v954_v55 = vpop.eup %953  ;;  %605 = vst.msk [vmem:[#allocation5] sm:$0xff] %vm604_vm3, %v600_v48  ;;  %v602_v56 = vmul.f32 %v952_v51, %v598_v39  ;;  %v621_v57 = vsub.f32 %v609_v46, %v617_v49  ;;  %v619_v58 = vmul.f32 %v952_v51, %v615_v43 }
 0x1d9   : > { %606 = vst.msk [vmem:[#allocation5 + $0x8] sm:$0xff] %vm604_vm3, %v601_v52  ;;  %v603_v60 = vmul.f32 %v954_v55, %v599_v41  ;;  %v622_v61 = vsub.f32 %v610_v50, %v618_v53  ;;  %v620_v62 = vmul.f32 %v954_v55, %v616_v45 }
 0x1da   : > { %607 = vst.msk [vmem:[#allocation5 + $0x10] sm:$0xff] %vm604_vm3, %v602_v56  ;;  %625 = vst.msk [vmem:[#allocation6] sm:$0xff] %vm604_vm3, %v621_v57  ;;  %v623_v63 = vsub.f32 %v611_v54, %v619_v58 }
 0x1db   : > { %608 = vst.msk [vmem:[#allocation5 + $0x18] sm:$0xff] %vm604_vm3, %v603_v60  ;;  %626 = vst.msk [vmem:[#allocation6 + $0x8] sm:$0xff] %vm604_vm3, %v622_v61  ;;  %v624_v0 = vsub.f32 %v612_v59, %v620_v62 }
 0x1dc   : > { %627 = vst.msk [vmem:[#allocation6 + $0x10] sm:$0xff] %vm604_vm3, %v623_v63 }
 0x1dd   : > { %628 = vst.msk [vmem:[#allocation6 + $0x18] sm:$0xff] %vm604_vm3, %v624_v0 }
 0x1de PF: > { %v998_v3 = vmov 0   ;;  %s832_s14 = sshll.u32 %s979_s15, 5  ;;  %vm691_vm4 = vcmask 130048  }
 0x1df   : > { %v635_v2 = vld [vmem:[#allocation5] sm:$0xff]  ;;  %956 = vset.pattern.permute.xlu1 %v998_v3  ;;  %955 = vset.pattern.permute.xlu0 %v998_v3  ;;  %s630_s22 = scalar_lea.vmem [#allocation2], %s832_s14 }
 0x1e0   : > { %641 = vperm.xlu0 %955, %v635_v2   ;;  %v636_v5 = vld [vmem:[#allocation5 + $0x8] sm:$0xff]  ;;  %v631_v12 = vld [vmem:[%s630_s22] sm:$0xff]  ;;  %v633_v18 = vld [vmem:[%s630_s22 + $0x10] sm:$0xff] }
 0x1e1   : > { %v637_v1 = vld [vmem:[#allocation5 + $0x10] sm:$0xff]  ;;  %v663_v7 = vld [vmem:[#allocation6] sm:$0xff]  ;;  %v632_v15 = vld [vmem:[%s630_s22 + $0x8] sm:$0xff] }
 0x1e2   : > { %651 = vperm.xlu1 %956, %v637_v1   ;;  %v638_v4 = vld [vmem:[#allocation5 + $0x18] sm:$0xff]  ;;  %v664_v6 = vld [vmem:[#allocation6 + $0x8] sm:$0xff] }
 0x1e3   : > { %v665_v9 = vld [vmem:[#allocation6 + $0x10] sm:$0xff]  ;;  %v634_v19 = vld [vmem:[%s630_s22 + $0x18] sm:$0xff] }
 0x1e4   : > { %646 = vperm.xlu0 %955, %v636_v5   ;;  %v666_v8 = vld [vmem:[#allocation6 + $0x18] sm:$0xff] }
 0x1e6   : > { %656 = vperm.xlu1 %956, %v638_v4  }
 0x1e8   : > { %669 = vperm.xlu0 %955, %v663_v7  }
 0x1ea   : > { %674 = vperm.xlu1 %956, %v664_v6  }
 0x1ec   : > { %679 = vperm.xlu0 %955, %v665_v9  }
 0x1ee   : > { %684 = vperm.xlu1 %956, %v666_v8  }
 0x25f   : > { %v642_v11 = vpop.permute.xlu0 %641 }
 0x260   : > { %v659_v16 = vmul.f32 %v642_v11, %v631_v12 }
 0x261   : > { %v652_v10 = vpop.permute.xlu1 %651 }
 0x262   : > { %v661_v24 = vmul.f32 %v652_v10, %v633_v18 }
 0x263   : > { %v647_v14 = vpop.permute.xlu0 %646 }
 0x264   : > { %v660_v17 = vmul.f32 %v647_v14, %v632_v15 }
 0x265   : > { %v657_v13 = vpop.permute.xlu1 %656 }
 0x266   : > { %v662_v25 = vmul.f32 %v657_v13, %v634_v19 }
 0x267   : > { %v670_v21 = vpop.permute.xlu0 %669 }
 0x268   : > { %v687_v23 = vadd.f32 %v670_v21, %v659_v16 }
 0x269   : > { %v675_v20 = vpop.permute.xlu1 %674 }
 0x26a   : > { %v688_v22 = vadd.f32 %v675_v20, %v660_v17  ;;  %692 = vst.msk [vmem:[%s1065_s29] sm:$0xff] %vm691_vm4, %v687_v23 }
 0x26b   : > { %v680_v27 = vpop.permute.xlu0 %679 }
 0x26c   : > { %693 = vst.msk [vmem:[%s1065_s29 + $0x8] sm:$0xff] %vm691_vm4, %v688_v22  ;;  %v689_v29 = vadd.f32 %v680_v27, %v661_v24 }
 0x26d   : > { %v685_v26 = vpop.permute.xlu1 %684 }
 0x26e   : > { %v690_v28 = vadd.f32 %v685_v26, %v662_v25  ;;  %694 = vst.msk [vmem:[%s1065_s29 + $0x10] sm:$0xff] %vm691_vm4, %v689_v29 }
 0x270   : > { %695 = vst.msk [vmem:[%s1065_s29 + $0x18] sm:$0xff] %vm691_vm4, %v690_v28 }
 0x271 PF: > { %s14_s19 = sadd.s32 1, %s995_s19   ;;  %s1182_s15 = smov %s987_s17 }
 0x272   : > { %p11_p11 = scmp.ge.s32.totalorder %s14_s19, 6   ;;  %s1183_s16 = smov %s991_s18 }
 0x273   : > { %s1184_s17 = smov %s1187_s20  ;;  %s1185_s18 = smov %s1191_s21 }
 0x274   :  { %13 = sbr.rel (!%p11_p11) target bundleno = 3 (0x3), region = 84 }

// kernel: feature_extractor_forward.4
= control target key start
LH: loop header
LB: loop body
LE: loop exit
PB: predicated region body
PF: predicated region fallthrough
CT: control target
= control target key end

     0   :  { %s1279_s15 = smov 0   ;;  %s1281_s16 = smov 0   ;;  %s1466_s0 = inlined_call_operand.vmem [shape: bf16[2,512,4], index: 0, kind: input, shape index: {}]   ;;  %s1467_s1 = inlined_call_operand.vmem [shape: bf16[32,512], index: 1, kind: input, shape index: {}]   ;;  %s1468_s2 = inlined_call_operand.vmem [shape: f32[32,1], index: 2, kind: input, shape index: {}]   ;;  %s1469_s3 = inlined_call_operand.vmem [shape: f32[32,1], index: 3, kind: input, shape index: {}]   ;;  %s1470_s4 = inlined_call_operand.vmem [shape: f32[2,32,4], index: 4, kind: output, shape index: {}]  }
   0x1   :  { %s1283_s17 = smov 0   ;;  %s1285_s18 = smov 0  }
   0x2   :  { %s1287_s19 = smov 0  }
   0x3 LB: > { %s29_s20 = sadd.s32 1, %s1242_s17  ;;  %s33_s21 = sadd.s32 1, %s1246_s18  ;;  %s1250_s19 = sphi %s1287_s19, %s14_s19   ;;  %s1246_s18 = sphi %s1285_s18, %s1474_s18   ;;  %s1242_s17 = sphi %s1283_s17, %s1473_s17   ;;  %s1238_s16 = sphi %s1281_s16, %s1472_s16   ;;  %s1234_s15 = sphi %s1279_s15, %s1471_s15  }
   0x4   : > { %p31_p0 = scmp.ge.s32.totalorder %s29_s20, 2  ;;  %p1003_p1 = scmp.ge.s32.totalorder %s1250_s19, 1 }
   0x5   : > { %p204_p2 = scmp.lt.s32.totalorder %s1250_s19, 5 }
   0x6   : > { %s1476_s20 = smov (%p31_p0, %s29_s20), 0  ;;  %s1478_s21 = smov (!%p31_p0, %s33_s21), %s1246_s18 }
   0x7   : > { %p205_p3 = pnand %p1003_p1, %p204_p2  ;;  %p35_p4 = scmp.ge.s32.totalorder %s1478_s21, 2 }
   0x8   : > { %s241_s22 = ssub.s32 (!%p205_p3), 1, %s1238_s16  ;;  %s255_s23 = smul.u32 (!%p205_p3), %s1234_s15, %s1238_s16 }
   0x9   : > { %s1480_s21 = smov (%p35_p4, %s1478_s21), 0  ;;  %208 = sbr.rel (%p205_p3) target bundleno = 633 (0x279), region = 36 }
   0xa   : > { %s242_s24 = smul.u32 (!%p205_p3), %s1234_s15, %s241_s22  ;;  %p257_p5 = scmp.lt.s32.totalorder (!%p205_p3), %s255_s23, 1 }
   0xb   : > { %p1008_p7 = scmp.ne.s32.totalorder (!%p205_p3), %s1238_s16, 0 }
   0xc   : > { %p244_p6 = scmp.lt.s32.totalorder (!%p205_p3), %s242_s24, 1 }
  0x10   : > { %s1482_s23 = smov (!%p257_p5, %s255_s23), 1  ;;  %s1484_s24 = smov (!%p244_p6, %s242_s24), 1 }
  0x11   : > { %s1057_s25 = sshll.u32 %s1482_s23, 5  ;;  %s1056_s26 = sshll.u32 %s1484_s24, 8 }
  0x12   : > { %s1320_s29 = scalar_lea.vmem %s1470_s4, %s1057_s25  ;;  %s1325_s6 = scalar_lea.vmem %s1466_s0, %s1056_s26 }
  0x13   : > { %272 = sbr.rel (%p1008_p7) target bundleno = 447 (0x1bf), region = 40  ;;  %p273_p8 = scmp.eq.s32.totalorder (!%p1008_p7), %s1234_s15, 0 }
  0x1a   : > { %278 = sbr.rel (!%p273_p8) target bundleno = 33 (0x21), region = 44  ;;  %vm279_vm0 = vcmask (%p273_p8), 7168   ;;  %v1252_v0 = vmov (%p273_p8), 0.0  }
  0x1b   : > { %280 = vst.msk [vmem:[#allocation3] sm:$0xff] (%p273_p8), %vm279_vm0, %v1252_v0  ;;  %281 = vst.msk [vmem:[#allocation3 + $0x8] sm:$0xff] (%p273_p8), %vm279_vm0, %v1252_v0 }
  0x1c   : > { %282 = vst.msk [vmem:[#allocation3 + $0x10] sm:$0xff] (%p273_p8), %vm279_vm0, %v1252_v0  ;;  %283 = vst.msk [vmem:[#allocation3 + $0x18] sm:$0xff] (%p273_p8), %vm279_vm0, %v1252_v0 }
  0x1d   : > { %284 = vst.msk [vmem:[#allocation4] sm:$0xff] (%p273_p8), %vm279_vm0, %v1252_v0  ;;  %285 = vst.msk [vmem:[#allocation4 + $0x8] sm:$0xff] (%p273_p8), %vm279_vm0, %v1252_v0 }
  0x1e   : > { %286 = vst.msk [vmem:[#allocation4 + $0x10] sm:$0xff] (%p273_p8), %vm279_vm0, %v1252_v0  ;;  %287 = vst.msk [vmem:[#allocation4 + $0x18] sm:$0xff] (%p273_p8), %vm279_vm0, %v1252_v0 }
  0x21 PF: > { %v1158_v1 = vld [vmem:[%s1325_s6 + $0x40] sm:$0xff]   ;;  %v1162_v5 = vld [vmem:[%s1325_s6 + $0x48] sm:$0xff]   ;;  %v1166_v9 = vld [vmem:[%s1325_s6 + $0x50] sm:$0xff]   ;;  %s1050_s5 = sshll.u32 %s1234_s15, 5  ;;  %vm692_vm1 = vcmask 31744   ;;  %vm717_vm2 = vcmask 7168  }
  0x22   : > { %v1159_v2 = vld [vmem:[%s1325_s6 + $0xc0] sm:$0xff]   ;;  %1060 = vmatprep.subr.bf16.mxu0 %v1158_v1  ;;  %v1163_v6 = vld [vmem:[%s1325_s6 + $0xc8] sm:$0xff]   ;;  %v1167_v10 = vld [vmem:[%s1325_s6 + $0xd0] sm:$0xff]  }
  0x23   : > { %v1160_v3 = vld [vmem:[%s1325_s6] sm:$0xff]   ;;  %1088 = vmatprep.subr.bf16.mxu1 %v1159_v2  ;;  %v1164_v7 = vld [vmem:[%s1325_s6 + $0x8] sm:$0xff]   ;;  %v1168_v11 = vld [vmem:[%s1325_s6 + $0x10] sm:$0xff]  }
  0x24   : > { %v1161_v4 = vld [vmem:[%s1325_s6 + $0x80] sm:$0xff]   ;;  %1061 = vmatpush3.bf16.msra.mxu0 %v1160_v3  ;;  %v1165_v8 = vld [vmem:[%s1325_s6 + $0x88] sm:$0xff]   ;;  %v1169_v12 = vld [vmem:[%s1325_s6 + $0x90] sm:$0xff]  }
  0x25   : > { %1089 = vmatpush3.bf16.msra.mxu1 %v1161_v4  ;;  %1062 = vmatprep.subr.bf16.mxu0 %v1162_v5  ;;  %v1170_v13 = vld [vmem:[%s1325_s6 + $0x58] sm:$0xff]   ;;  %v1174_v17 = vld [vmem:[%s1325_s6 + $0x60] sm:$0xff]   ;;  %v1178_v21 = vld [vmem:[%s1325_s6 + $0x68] sm:$0xff]  }
  0x26   : > { %1090 = vmatprep.subr.bf16.mxu1 %v1163_v6  ;;  %v1171_v14 = vld [vmem:[%s1325_s6 + $0xd8] sm:$0xff]   ;;  %v1175_v18 = vld [vmem:[%s1325_s6 + $0xe0] sm:$0xff]   ;;  %v1179_v22 = vld [vmem:[%s1325_s6 + $0xe8] sm:$0xff]  }
  0x27   : > { %v1172_v15 = vld [vmem:[%s1325_s6 + $0x18] sm:$0xff]   ;;  %v1176_v19 = vld [vmem:[%s1325_s6 + $0x20] sm:$0xff]   ;;  %v1180_v23 = vld [vmem:[%s1325_s6 + $0x28] sm:$0xff]  }
  0x28   : > { %1063 = vmatpush3.bf16.msra.mxu0 %v1164_v7  ;;  %v1173_v16 = vld [vmem:[%s1325_s6 + $0x98] sm:$0xff]   ;;  %v1177_v20 = vld [vmem:[%s1325_s6 + $0xa0] sm:$0xff]   ;;  %v1181_v24 = vld [vmem:[%s1325_s6 + $0xa8] sm:$0xff]  }
  0x29   : > { %1091 = vmatpush3.bf16.msra.mxu1 %v1165_v8  ;;  %1064 = vmatprep.subr.bf16.mxu0 %v1166_v9  ;;  %v1182_v25 = vld [vmem:[%s1325_s6 + $0x70] sm:$0xff]   ;;  %v1186_v29 = vld [vmem:[%s1325_s6 + $0x78] sm:$0xff]  }
  0x2a   : > { %1092 = vmatprep.subr.bf16.mxu1 %v1167_v10  ;;  %v1183_v26 = vld [vmem:[%s1325_s6 + $0xf0] sm:$0xff]   ;;  %v1187_v30 = vld [vmem:[%s1325_s6 + $0xf8] sm:$0xff]  }
  0x2b   : > { %v1184_v27 = vld [vmem:[%s1325_s6 + $0x30] sm:$0xff]   ;;  %v1188_v31 = vld [vmem:[%s1325_s6 + $0x38] sm:$0xff]  }
  0x2c   : > { %1065 = vmatpush3.bf16.msra.mxu0 %v1168_v11  ;;  %v1185_v28 = vld [vmem:[%s1325_s6 + $0xb0] sm:$0xff]   ;;  %v1189_v32 = vld [vmem:[%s1325_s6 + $0xb8] sm:$0xff]   ;;  %s1386_s6 = scalar_lea.vmem [#allocation2], %s1050_s5 }
  0x2d   : > { %1093 = vmatpush3.bf16.msra.mxu1 %v1169_v12  ;;  %1066 = vmatprep.subr.bf16.mxu0 %v1170_v13  ;;  %v1190_v33 = vld [vmem:[%s1467_s1] ss:$16 sps:$4 sm:$0xff]   ;;  %v1192_v34 = vld [vmem:[%s1467_s1 + $0x4] ss:$16 sps:$4 sm:$0xff]   ;;  %v1193_v35 = vld [vmem:[%s1467_s1 + $0x8] ss:$16 sps:$4 sm:$0xff]  }
  0x2e   : > { %1094 = vmatprep.subr.bf16.mxu1 %v1171_v14  ;;  %v1195_v36 = vld [vmem:[%s1467_s1 + $0xc] ss:$16 sps:$4 sm:$0xff]   ;;  %624 = vmatprep.mubr.bf16.mxu0 %v1192_v34  ;;  %v1196_v37 = vld [vmem:[%s1467_s1 + $0x24] ss:$16 sps:$4 sm:$0xff]   ;;  %v1200_v39 = vld [vmem:[%s1467_s1 + $0x20] ss:$16 sps:$4 sm:$0xff]  }
  0x2f   : > { %673 = vmatprep.mubr.bf16.mxu1 %v1195_v36  ;;  %v1198_v38 = vld [vmem:[%s1467_s1 + $0x2c] ss:$16 sps:$4 sm:$0xff]   ;;  %v1201_v40 = vld [vmem:[%s1467_s1 + $0x28] ss:$16 sps:$4 sm:$0xff]  }
  0x30   : > { %1067 = vmatpush3.bf16.msra.mxu0 %v1172_v15 }
  0x31   : > { %1095 = vmatpush3.bf16.msra.mxu1 %v1173_v16  ;;  %1068 = vmatprep.subr.bf16.mxu0 %v1174_v17  ;;  %v697_v17 = vld [vmem:[#allocation3] sm:$0xff] }
  0x32   : > { %1096 = vmatprep.subr.bf16.mxu1 %v1175_v18 }
  0x34   : > { %1069 = vmatpush3.bf16.msra.mxu0 %v1176_v19 }
  0x35   : > { %1097 = vmatpush3.bf16.msra.mxu1 %v1177_v20  ;;  %1070 = vmatprep.subr.bf16.mxu0 %v1178_v21  ;;  %v723_v20 = vld [vmem:[#allocation4 + $0x8] sm:$0xff] }
  0x36   : > { %1098 = vmatprep.subr.bf16.mxu1 %v1179_v22  ;;  %v698_v21 = vld [vmem:[#allocation3 + $0x8] sm:$0xff] }
  0x38   : > { %1071 = vmatpush3.bf16.msra.mxu0 %v1180_v23 }
  0x39   : > { %1099 = vmatpush3.bf16.msra.mxu1 %v1181_v24  ;;  %1072 = vmatprep.subr.bf16.mxu0 %v1182_v25 }
  0x3a   : > { %1100 = vmatprep.subr.bf16.mxu1 %v1183_v26  ;;  %v699_v26 = vld [vmem:[#allocation3 + $0x10] sm:$0xff] }
  0x3c   : > { %1073 = vmatpush3.bf16.msra.mxu0 %v1184_v27  ;;  %v722_v27 = vld [vmem:[#allocation4] sm:$0xff] }
  0x3d   : > { %1101 = vmatpush3.bf16.msra.mxu1 %v1185_v28  ;;  %1074 = vmatprep.subr.bf16.mxu0 %v1186_v29 }
  0x3e   : > { %1102 = vmatprep.subr.bf16.mxu1 %v1187_v30 }
  0x40   : > { %1075 = vmatpush3.bf16.msra.mxu0 %v1188_v31 }
  0x41   : > { %1103 = vmatpush3.bf16.msra.mxu1 %v1189_v32  ;;  %v700_v32 = vld [vmem:[#allocation3 + $0x18] sm:$0xff] }
  0x43   : > { %625 = vmatmul.mubr.bf16.vlgmr.msra.gmra.mrb[0].mxu0 %v1190_v33  ;;  %v724_v33 = vld [vmem:[#allocation4 + $0x10] sm:$0xff] }
  0x44   : > { %674 = vmatmul.mubr.bf16.vlgmr.msra.gmra.mrb[0].mxu1 %v1193_v35  ;;  %632 = vmatprep.mubr.bf16.mxu0 %v1196_v37 }
  0x45   : > { %681 = vmatprep.mubr.bf16.mxu1 %v1198_v38  ;;  %v725_v38 = vld [vmem:[#allocation4 + $0x18] sm:$0xff] }
  0x4b   : > { %633 = vmatmul.mubr.bf16.gmra.mrb[4].mxu0 %v1200_v39 }
  0x4c   : > { %682 = vmatmul.mubr.bf16.gmra.mrb[4].mxu1 %v1201_v40 }
 0x116   : > { %v1076_v41 = vpop.f32.mrb[0].mxu0 }
 0x117   : > { %v1104_v42 = vpop.f32.mrb[0].mxu1  ;;  %v1077_v43 = vpop.f32.mrb[1].mxu0 }
 0x118   : > { %v1078_v44 = vadd.f32 %v1077_v43, %v1076_v41  ;;  %v1105_v45 = vpop.f32.mrb[1].mxu1  ;;  %v1079_v46 = vpop.f32.mrb[2].mxu0 }
 0x119   : > { %v1106_v47 = vadd.f32 %v1105_v45, %v1104_v42  ;;  %v1107_v48 = vpop.f32.mrb[2].mxu1  ;;  %v1080_v49 = vpop.f32.mrb[3].mxu0 }
 0x11a   : > { %v1081_v50 = vadd.f32 %v1080_v49, %v1079_v46  ;;  %v1108_v51 = vpop.f32.mrb[3].mxu1 }
 0x11b   : > { %v676_v52 = vadd.f32 %v1106_v47, %v1078_v44  ;;  %v1109_v53 = vadd.f32 %v1108_v51, %v1107_v48 }
 0x11d   : > { %693 = vst.msk [vmem:[%s1386_s6] sm:$0xff] %vm692_vm1, %v676_v52  ;;  %v679_v54 = vadd.f32 %v1109_v53, %v1081_v50  ;;  %v701_v55 = vsel %vm692_vm1, %v676_v52, 0.0  ;;  %v726_v4 = vmul.f32 %v676_v52, %v676_v52 }
 0x11e   : > { %702 = vadd.xlane.f32.xlu0 %v701_v55  ;;  %v1082_v56 = vpop.f32.mrb[4].mxu0 }
 0x11f   : > { %694 = vst.msk [vmem:[%s1386_s6 + $0x8] sm:$0xff] %vm692_vm1, %v679_v54  ;;  %v1110_v57 = vpop.f32.mrb[4].mxu1  ;;  %v1083_v58 = vpop.f32.mrb[5].mxu0  ;;  %v727_v59 = vmul.f32 %v679_v54, %v679_v54  ;;  %v704_v3 = vsel %vm692_vm1, %v679_v54, 0.0  ;;  %v730_v11 = vsel %vm692_vm1, %v726_v4, 0.0 }
 0x120   : > { %v1084_v60 = vadd.f32 %v1083_v58, %v1082_v56  ;;  %v1111_v61 = vpop.f32.mrb[5].mxu1  ;;  %v1085_v62 = vpop.f32.mrb[6].mxu0 }
 0x121   : > { %v1112_v63 = vadd.f32 %v1111_v61, %v1110_v57  ;;  %v1113_v0 = vpop.f32.mrb[6].mxu1  ;;  %v1086_v1 = vpop.f32.mrb[7].mxu0  ;;  %v733_v2 = vsel %vm692_vm1, %v727_v59, 0.0 }
 0x122   : > { %v1087_v5 = vadd.f32 %v1086_v1, %v1085_v62  ;;  %v1114_v6 = vpop.f32.mrb[7].mxu1  ;;  %734 = vadd.xlane.f32.xlu1 %v733_v2  ;;  %705 = vadd.xlane.f32.xlu0 %v704_v3 }
 0x123   : > { %v684_v7 = vadd.f32 %v1112_v63, %v1084_v60  ;;  %v1115_v8 = vadd.f32 %v1114_v6, %v1113_v0 }
 0x125   : > { %695 = vst.msk [vmem:[%s1386_s6 + $0x10] sm:$0xff] %vm692_vm1, %v684_v7  ;;  %v687_v9 = vadd.f32 %v1115_v8, %v1087_v5  ;;  %v707_v10 = vsel %vm692_vm1, %v684_v7, 0.0  ;;  %v728_v12 = vmul.f32 %v684_v7, %v684_v7 }
 0x126   : > { %708 = vadd.xlane.f32.xlu1 %v707_v10  ;;  %731 = vadd.xlane.f32.xlu0 %v730_v11 }
 0x127   : > { %696 = vst.msk [vmem:[%s1386_s6 + $0x18] sm:$0xff] %vm692_vm1, %v687_v9  ;;  %v710_v13 = vsel %vm692_vm1, %v687_v9, 0.0  ;;  %v736_v14 = vsel %vm692_vm1, %v728_v12, 0.0  ;;  %v729_v15 = vmul.f32 %v687_v9, %v687_v9 }
 0x129   : > { %v739_v16 = vsel %vm692_vm1, %v729_v15, 0.0 }
 0x12a   : > { %711 = vadd.xlane.f32.xlu1 %v710_v13  ;;  %737 = vadd.xlane.f32.xlu0 %v736_v14 }
 0x12e   : > { %740 = vadd.xlane.f32.xlu1 %v739_v16 }
 0x1ab   : > { %v703_v18 = vpop.xlane.xlu0 %702 }
 0x1ac   : > { %v713_v19 = vadd.f32 %v703_v18, %v697_v17 }
 0x1ae   : > { %718 = vst.msk [vmem:[#allocation3] sm:$0xff] %vm717_vm2, %v713_v19 }
 0x1af   : > { %v735_v22 = vpop.xlane.xlu1 %734  ;;  %v706_v23 = vpop.xlane.xlu0 %705 }
 0x1b0   : > { %v743_v24 = vadd.f32 %v735_v22, %v723_v20  ;;  %v714_v25 = vadd.f32 %v706_v23, %v698_v21 }
 0x1b2   : > { %747 = vst.msk [vmem:[#allocation4 + $0x8] sm:$0xff] %vm717_vm2, %v743_v24  ;;  %719 = vst.msk [vmem:[#allocation3 + $0x8] sm:$0xff] %vm717_vm2, %v714_v25 }
 0x1b3   : > { %v709_v28 = vpop.xlane.xlu1 %708  ;;  %v732_v29 = vpop.xlane.xlu0 %731 }
 0x1b4   : > { %v715_v30 = vadd.f32 %v709_v28, %v699_v26  ;;  %v742_v31 = vadd.f32 %v732_v29, %v722_v27 }
 0x1b6   : > { %720 = vst.msk [vmem:[#allocation3 + $0x10] sm:$0xff] %vm717_vm2, %v715_v30  ;;  %746 = vst.msk [vmem:[#allocation4] sm:$0xff] %vm717_vm2, %v742_v31 }
 0x1b7   : > { %v712_v34 = vpop.xlane.xlu1 %711  ;;  %v738_v35 = vpop.xlane.xlu0 %737 }
 0x1b8   : > { %v716_v36 = vadd.f32 %v712_v34, %v700_v32  ;;  %v744_v37 = vadd.f32 %v738_v35, %v724_v33 }
 0x1ba   : > { %721 = vst.msk [vmem:[#allocation3 + $0x18] sm:$0xff] %vm717_vm2, %v716_v36  ;;  %748 = vst.msk [vmem:[#allocation4 + $0x10] sm:$0xff] %vm717_vm2, %v744_v37 }
 0x1bb   : > { %v741_v39 = vpop.xlane.xlu1 %740 }
 0x1bc   : > { %v745_v40 = vadd.f32 %v741_v39, %v725_v38 }
 0x1be   : > { %749 = vst.msk [vmem:[#allocation4 + $0x18] sm:$0xff] %vm717_vm2, %v745_v40 }
 0x1bf PF: > { %p1051_p9 = scmp.ne.s32.totalorder %s1238_s16, 1 }
 0x1c0   : > { %p754_p10 = scmp.eq.s32.totalorder (!%p1051_p9), %s1234_s15, 0 }
 0x1c1   : > { %753 = sbr.rel (%p1051_p9) target bundleno = 633 (0x279), region = 48 }
 0x1c8   : > { %759 = sbr.rel (!%p754_p10) target bundleno = 486 (0x1e6), region = 52  ;;  %v760_v41 = vld [vmem:[#allocation3] sm:$0xff] (%p754_p10)  ;;  %v761_v45 = vld [vmem:[#allocation3 + $0x8] sm:$0xff] (%p754_p10)  ;;  %v762_v49 = vld [vmem:[#allocation3 + $0x10] sm:$0xff] (%p754_p10)  ;;  %vm805_vm3 = vcmask (%p754_p10), 7168  }
 0x1c9   : > { %v769_v42 = vld [vmem:[#allocation4] sm:$0xff] (%p754_p10)  ;;  %v765_v43 = vmul.f32 (%p754_p10), 0.125, %v760_v41  ;;  %v770_v46 = vld [vmem:[#allocation4 + $0x8] sm:$0xff] (%p754_p10)  ;;  %v766_v47 = vmul.f32 (%p754_p10), 0.125, %v761_v45  ;;  %v771_v50 = vld [vmem:[#allocation4 + $0x10] sm:$0xff] (%p754_p10)  ;;  %v767_v52 = vmul.f32 (%p754_p10), 0.125, %v762_v49 }
 0x1ca   : > { %v773_v44 = vmul.f32 (%p754_p10), 0.125, %v769_v42  ;;  %v774_v48 = vmul.f32 (%p754_p10), 0.125, %v770_v46  ;;  %v775_v53 = vmul.f32 (%p754_p10), 0.125, %v771_v50  ;;  %v763_v54 = vld [vmem:[#allocation3 + $0x18] sm:$0xff] (%p754_p10)  ;;  %v797_v9 = vld [vmem:[%s1468_s2] sm:$0xff] (%p754_p10)  ;;  %v798_v10 = vld [vmem:[%s1468_s2 + $0x8] sm:$0xff] (%p754_p10) }
 0x1cb   : > { %v777_v51 = vmul.f32 (%p754_p10), %v765_v43, %v765_v43  ;;  %v772_v55 = vld [vmem:[#allocation4 + $0x18] sm:$0xff] (%p754_p10)  ;;  %v778_v56 = vmul.f32 (%p754_p10), %v766_v47, %v766_v47  ;;  %v768_v57 = vmul.f32 (%p754_p10), 0.125, %v763_v54  ;;  %v779_v60 = vmul.f32 (%p754_p10), %v767_v52, %v767_v52  ;;  %v799_v11 = vld [vmem:[%s1468_s2 + $0x10] sm:$0xff] (%p754_p10)  ;;  %v810_v18 = vld [vmem:[%s1469_s3] sm:$0xff] (%p754_p10) }
 0x1cc   : > { %v776_v58 = vmul.f32 (%p754_p10), 0.125, %v772_v55  ;;  %v814_v12 = vmul.f32 (%p754_p10), %v797_v9, %v765_v43  ;;  %v800_v13 = vld [vmem:[%s1468_s2 + $0x18] sm:$0xff] (%p754_p10)  ;;  %v815_v14 = vmul.f32 (%p754_p10), %v798_v10, %v766_v47  ;;  %v816_v15 = vmul.f32 (%p754_p10), %v799_v11, %v767_v52  ;;  %v811_v22 = vld [vmem:[%s1469_s3 + $0x8] sm:$0xff] (%p754_p10)  ;;  %v812_v26 = vld [vmem:[%s1469_s3 + $0x10] sm:$0xff] (%p754_p10) }
 0x1cd   : > { %v781_v59 = vsub.f32 (%p754_p10), %v773_v44, %v777_v51  ;;  %v782_v61 = vsub.f32 (%p754_p10), %v774_v48, %v778_v56  ;;  %v780_v62 = vmul.f32 (%p754_p10), %v768_v57, %v768_v57  ;;  %v783_v0 = vsub.f32 (%p754_p10), %v775_v53, %v779_v60  ;;  %v813_v31 = vld [vmem:[%s1469_s3 + $0x18] sm:$0xff] (%p754_p10) }
 0x1ce   : > { %v817_v17 = vmul.f32 (%p754_p10), %v800_v13, %v768_v57 }
 0x1cf   : > { %v785_v63 = vmax.f32 %v781_v59, 0.0  ;;  %v786_v1 = vmax.f32 %v782_v61, 0.0  ;;  %v784_v2 = vsub.f32 %v776_v58, %v780_v62  ;;  %v787_v4 = vmax.f32 %v783_v0, 0.0 }
 0x1d1   : > { %v789_v3 = vadd.f32 1e-05, %v785_v63  ;;  %v790_v5 = vadd.f32 1e-05, %v786_v1  ;;  %v788_v6 = vmax.f32 %v784_v2, 0.0 }
 0x1d2   : > { %v791_v7 = vadd.f32 1e-05, %v787_v4 }
 0x1d3   : > { %1202 = vrsqrt.f32 %v789_v3  ;;  %v792_v8 = vadd.f32 1e-05, %v788_v6 }
 0x1d4   : > { %1204 = vrsqrt.f32 %v790_v5 }
 0x1d5   : > { %1206 = vrsqrt.f32 %v791_v7 }
 0x1d6   : > { %1208 = vrsqrt.f32 %v792_v8 }
 0x1dd   : > { %v1203_v16 = vpop.eup %1202 }
 0x1de   : > { %v1205_v19 = vpop.eup %1204  ;;  %v801_v20 = vmul.f32 %v1203_v16, %v797_v9  ;;  %v818_v21 = vmul.f32 %v1203_v16, %v814_v12 }
 0x1df   : > { %v1207_v23 = vpop.eup %1206  ;;  %v802_v24 = vmul.f32 %v1205_v19, %v798_v10  ;;  %v819_v25 = vmul.f32 %v1205_v19, %v815_v14 }
 0x1e0   : > { %v1209_v27 = vpop.eup %1208  ;;  %806 = vst.msk [vmem:[#allocation5] sm:$0xff] %vm805_vm3, %v801_v20  ;;  %v803_v28 = vmul.f32 %v1207_v23, %v799_v11  ;;  %v822_v29 = vsub.f32 %v810_v18, %v818_v21  ;;  %v820_v30 = vmul.f32 %v1207_v23, %v816_v15 }
 0x1e1   : > { %807 = vst.msk [vmem:[#allocation5 + $0x8] sm:$0xff] %vm805_vm3, %v802_v24  ;;  %v804_v32 = vmul.f32 %v1209_v27, %v800_v13  ;;  %v823_v33 = vsub.f32 %v811_v22, %v819_v25  ;;  %v821_v34 = vmul.f32 %v1209_v27, %v817_v17 }
 0x1e2   : > { %808 = vst.msk [vmem:[#allocation5 + $0x10] sm:$0xff] %vm805_vm3, %v803_v28  ;;  %826 = vst.msk [vmem:[#allocation6] sm:$0xff] %vm805_vm3, %v822_v29  ;;  %v824_v35 = vsub.f32 %v812_v26, %v820_v30 }
 0x1e3   : > { %809 = vst.msk [vmem:[#allocation5 + $0x18] sm:$0xff] %vm805_vm3, %v804_v32  ;;  %827 = vst.msk [vmem:[#allocation6 + $0x8] sm:$0xff] %vm805_vm3, %v823_v33  ;;  %v825_v36 = vsub.f32 %v813_v31, %v821_v34 }
 0x1e4   : > { %828 = vst.msk [vmem:[#allocation6 + $0x10] sm:$0xff] %vm805_vm3, %v824_v35 }
 0x1e5   : > { %829 = vst.msk [vmem:[#allocation6 + $0x18] sm:$0xff] %vm805_vm3, %v825_v36 }
 0x1e6 PF: > { %v1253_v39 = vmov 0   ;;  %s1053_s30 = sshll.u32 %s1234_s15, 5  ;;  %vm892_vm4 = vcmask 31744  }
 0x1e7   : > { %v836_v38 = vld [vmem:[#allocation5] sm:$0xff]  ;;  %1211 = vset.pattern.permute.xlu1 %v1253_v39  ;;  %1210 = vset.pattern.permute.xlu0 %v1253_v39  ;;  %s831_s5 = scalar_lea.vmem [#allocation2], %s1053_s30 }
 0x1e8   : > { %842 = vperm.xlu0 %1210, %v836_v38   ;;  %v837_v41 = vld [vmem:[#allocation5 + $0x8] sm:$0xff]  ;;  %v832_v48 = vld [vmem:[%s831_s5] sm:$0xff]  ;;  %v834_v54 = vld [vmem:[%s831_s5 + $0x10] sm:$0xff] }
 0x1e9   : > { %v838_v37 = vld [vmem:[#allocation5 + $0x10] sm:$0xff]  ;;  %v864_v43 = vld [vmem:[#allocation6] sm:$0xff]  ;;  %v833_v51 = vld [vmem:[%s831_s5 + $0x8] sm:$0xff] }
 0x1ea   : > { %852 = vperm.xlu1 %1211, %v838_v37   ;;  %v839_v40 = vld [vmem:[#allocation5 + $0x18] sm:$0xff]  ;;  %v865_v42 = vld [vmem:[#allocation6 + $0x8] sm:$0xff] }
 0x1eb   : > { %v866_v45 = vld [vmem:[#allocation6 + $0x10] sm:$0xff]  ;;  %v835_v55 = vld [vmem:[%s831_s5 + $0x18] sm:$0xff] }
 0x1ec   : > { %847 = vperm.xlu0 %1210, %v837_v41   ;;  %v867_v44 = vld [vmem:[#allocation6 + $0x18] sm:$0xff] }
 0x1ee   : > { %857 = vperm.xlu1 %1211, %v839_v40  }
 0x1f0   : > { %870 = vperm.xlu0 %1210, %v864_v43  }
 0x1f2   : > { %875 = vperm.xlu1 %1211, %v865_v42  }
 0x1f4   : > { %880 = vperm.xlu0 %1210, %v866_v45  }
 0x1f6   : > { %885 = vperm.xlu1 %1211, %v867_v44  }
 0x267   : > { %v843_v47 = vpop.permute.xlu0 %842 }
 0x268   : > { %v860_v52 = vmul.f32 %v843_v47, %v832_v48 }
 0x269   : > { %v853_v46 = vpop.permute.xlu1 %852 }
 0x26a   : > { %v862_v60 = vmul.f32 %v853_v46, %v834_v54 }
 0x26b   : > { %v848_v50 = vpop.permute.xlu0 %847 }
 0x26c   : > { %v861_v53 = vmul.f32 %v848_v50, %v833_v51 }
 0x26d   : > { %v858_v49 = vpop.permute.xlu1 %857 }
 0x26e   : > { %v863_v61 = vmul.f32 %v858_v49, %v835_v55 }
 0x26f   : > { %v871_v57 = vpop.permute.xlu0 %870 }
 0x270   : > { %v888_v59 = vadd.f32 %v871_v57, %v860_v52 }
 0x271   : > { %v876_v56 = vpop.permute.xlu1 %875 }
 0x272   : > { %v889_v58 = vadd.f32 %v876_v56, %v861_v53  ;;  %893 = vst.msk [vmem:[%s1320_s29] sm:$0xff] %vm892_vm4, %v888_v59 }
 0x273   : > { %v881_v63 = vpop.permute.xlu0 %880 }
 0x274   : > { %894 = vst.msk [vmem:[%s1320_s29 + $0x8] sm:$0xff] %vm892_vm4, %v889_v58  ;;  %v890_v1 = vadd.f32 %v881_v63, %v862_v60 }
 0x275   : > { %v886_v62 = vpop.permute.xlu1 %885 }
 0x276   : > { %v891_v0 = vadd.f32 %v886_v62, %v863_v61  ;;  %895 = vst.msk [vmem:[%s1320_s29 + $0x10] sm:$0xff] %vm892_vm4, %v890_v1 }
 0x278   : > { %896 = vst.msk [vmem:[%s1320_s29 + $0x18] sm:$0xff] %vm892_vm4, %v891_v0 }
 0x279 PF: > { %s14_s19 = sadd.s32 1, %s1250_s19   ;;  %s1471_s15 = smov %s1242_s17 }
 0x27a   : > { %p11_p11 = scmp.ge.s32.totalorder %s14_s19, 6   ;;  %s1472_s16 = smov %s1246_s18 }
 0x27b   : > { %s1473_s17 = smov %s1476_s20  ;;  %s1474_s18 = smov %s1480_s21 }
 0x27c   :  { %13 = sbr.rel (!%p11_p11) target bundleno = 3 (0x3), region = 84 }

// kernel: feature_extractor_forward.6
= control target key start
LH: loop header
LB: loop body
LE: loop exit
PB: predicated region body
PF: predicated region fallthrough
CT: control target
= control target key end

     0   :  { %s799_s15 = smov 0   ;;  %s801_s16 = smov 0   ;;  %s899_s0 = inlined_call_operand.vmem [shape: bf16[2,128,64], index: 0, kind: input, shape index: {}]   ;;  %s900_s1 = inlined_call_operand.vmem [shape: bf16[16,128], index: 1, kind: input, shape index: {}]   ;;  %s901_s2 = inlined_call_operand.vmem [shape: f32[16,1], index: 2, kind: input, shape index: {}]   ;;  %s902_s3 = inlined_call_operand.vmem [shape: f32[16,1], index: 3, kind: input, shape index: {}]   ;;  %s903_s4 = inlined_call_operand.vmem [shape: f32[2,16,64], index: 4, kind: output, shape index: {}]  }
   0x1   :  { %s803_s17 = smov 0   ;;  %s805_s18 = smov 0  }
   0x2   :  { %s807_s19 = smov 0  }
   0x3 LB: > { %s29_s20 = sadd.s32 1, %s760_s17  ;;  %s33_s21 = sadd.s32 1, %s764_s18  ;;  %s768_s19 = sphi %s807_s19, %s14_s19   ;;  %s764_s18 = sphi %s805_s18, %s907_s18   ;;  %s760_s17 = sphi %s803_s17, %s906_s17   ;;  %s756_s16 = sphi %s801_s16, %s905_s16   ;;  %s752_s15 = sphi %s799_s15, %s904_s15  }
   0x4   : > { %p31_p0 = scmp.ge.s32.totalorder %s29_s20, 2  ;;  %p616_p1 = scmp.ge.s32.totalorder %s768_s19, 1 }
   0x5   : > { %p204_p2 = scmp.lt.s32.totalorder %s768_s19, 5 }
   0x6   : > { %s909_s20 = smov (%p31_p0, %s29_s20), 0  ;;  %s911_s21 = smov (!%p31_p0, %s33_s21), %s764_s18 }
   0x7   : > { %p205_p3 = pnand %p616_p1, %p204_p2  ;;  %p35_p4 = scmp.ge.s32.totalorder %s911_s21, 2 }
   0x8   : > { %s241_s22 = ssub.s32 (!%p205_p3), 1, %s756_s16  ;;  %s255_s23 = smul.u32 (!%p205_p3), %s752_s15, %s756_s16 }
   0x9   : > { %s913_s21 = smov (%p35_p4, %s911_s21), 0  ;;  %208 = sbr.rel (%p205_p3) target bundleno = 608 (0x260), region = 36 }
   0xa   : > { %s242_s24 = smul.u32 (!%p205_p3), %s752_s15, %s241_s22  ;;  %p257_p5 = scmp.lt.s32.totalorder (!%p205_p3), %s255_s23, 1 }
   0xb   : > { %p621_p7 = scmp.ne.s32.totalorder (!%p205_p3), %s756_s16, 0 }
   0xc   : > { %p244_p6 = scmp.lt.s32.totalorder (!%p205_p3), %s242_s24, 1 }
  0x10   : > { %s915_s23 = smov (!%p257_p5, %s255_s23), 1  ;;  %s917_s24 = smov (!%p244_p6, %s242_s24), 1 }
  0x11   : > { %s639_s25 = sshll.u32 %s915_s23, 4  ;;  %s638_s26 = sshll.u32 %s917_s24, 6 }
  0x12   : > { %s840_s29 = scalar_lea.vmem %s903_s4, %s639_s25  ;;  %s845_s6 = scalar_lea.vmem %s899_s0, %s638_s26 }
  0x13   : > { %272 = sbr.rel (%p621_p7) target bundleno = 430 (0x1ae), region = 40  ;;  %p273_p8 = scmp.eq.s32.totalorder (!%p621_p7), %s752_s15, 0 }
  0x1a   : > { %278 = sbr.rel (!%p273_p8) target bundleno = 33 (0x21), region = 44  ;;  %vm279_vm0 = vcmask (%p273_p8), 7168   ;;  %v770_v0 = vmov (%p273_p8), 0.0  }
  0x1b   : > { %280 = vst.msk [vmem:[#allocation3] sm:$0xff] (%p273_p8), %vm279_vm0, %v770_v0  ;;  %281 = vst.msk [vmem:[#allocation3 + $0x8] sm:$0xff] (%p273_p8), %vm279_vm0, %v770_v0 }
  0x1c   : > { %282 = vst.msk [vmem:[#allocation4] sm:$0xff] (%p273_p8), %vm279_vm0, %v770_v0  ;;  %283 = vst.msk [vmem:[#allocation4 + $0x8] sm:$0xff] (%p273_p8), %vm279_vm0, %v770_v0 }
  0x21 PF: > { %v715_v1 = vld [vmem:[%s845_s6] sm:$0xff]   ;;  %v771_v2 = vmov 0.0   ;;  %v716_v3 = vld [vmem:[%s845_s6 + $0x8] sm:$0xff]   ;;  %vm772_vm1 = vmmov 0   ;;  %v717_v4 = vld [vmem:[%s845_s6 + $0x10] sm:$0xff]   ;;  %s632_s9 = sshll.u32 %s752_s15, 4 }
  0x22   : > { %651 = vmatprep.subr.bf16.mxu0 %v771_v2  ;;  %667 = vmatprep.mubr.msk.bf16.mxu0 %vm772_vm1, %v771_v2  ;;  %v718_v5 = vld [vmem:[%s845_s6 + $0x18] sm:$0xff]   ;;  %v719_v6 = vld [vmem:[%s845_s6 + $0x20] sm:$0xff]   ;;  %v720_v7 = vld [vmem:[%s845_s6 + $0x28] sm:$0xff]   ;;  %vm399_vm2 = vcmask 523264   ;;  %s398_s10 = scalar_lea.vmem [#allocation2], %s632_s9  ;;  %vm412_vm3 = vcmask 7168  }
  0x23   : > { %652 = vmatpush3.bf16.msra.mxu0 %v715_v1  ;;  %v721_v8 = vld [vmem:[%s845_s6 + $0x30] sm:$0xff]   ;;  %v722_v9 = vld [vmem:[%s845_s6 + $0x38] sm:$0xff]   ;;  %v723_v10 = vld [vmem:[%s900_s1] sm:$0xff]  }
  0x24   : > { %653 = vmatprep.subr.bf16.mxu0 %v771_v2  ;;  %v402_v21 = vld [vmem:[#allocation3] sm:$0xff]  ;;  %v415_v23 = vld [vmem:[#allocation4] sm:$0xff]  ;;  %v403_v26 = vld [vmem:[#allocation3 + $0x8] sm:$0xff] }
  0x25   : > { %v416_v29 = vld [vmem:[#allocation4 + $0x8] sm:$0xff] }
  0x27   : > { %654 = vmatpush3.bf16.msra.mxu0 %v716_v3 }
  0x28   : > { %655 = vmatprep.subr.bf16.mxu0 %v771_v2 }
  0x2b   : > { %656 = vmatpush3.bf16.msra.mxu0 %v717_v4 }
  0x2c   : > { %657 = vmatprep.subr.bf16.mxu0 %v771_v2 }
  0x2f   : > { %658 = vmatpush3.bf16.msra.mxu0 %v718_v5 }
  0x30   : > { %659 = vmatprep.subr.bf16.mxu0 %v771_v2 }
  0x33   : > { %660 = vmatpush3.bf16.msra.mxu0 %v719_v6 }
  0x34   : > { %661 = vmatprep.subr.bf16.mxu0 %v771_v2 }
  0x37   : > { %662 = vmatpush3.bf16.msra.mxu0 %v720_v7 }
  0x38   : > { %663 = vmatprep.subr.bf16.mxu0 %v771_v2 }
  0x3b   : > { %664 = vmatpush3.bf16.msra.mxu0 %v721_v8 }
  0x3c   : > { %665 = vmatprep.subr.bf16.mxu0 %v771_v2 }
  0x3f   : > { %666 = vmatpush3.bf16.msra.mxu0 %v722_v9 }
  0x42   : > { %668 = vmatmul.mubr.bf16.vlgmr.msra.gmra.mrb[0].mxu0 %v723_v10 }
 0x115   : > { %v390_v11 = vpop.f32.mrb[0].mxu0 }
 0x116   : > { %400 = vst.msk [vmem:[%s398_s10] sm:$0xff] %vm399_vm2, %v390_v11  ;;  %v669_v12 = vpop.f32.mrb[1].mxu0  ;;  %v404_v13 = vsel %vm399_vm2, %v390_v11, 0.0  ;;  %v417_v14 = vmul.f32 %v390_v11, %v390_v11 }
 0x117   : > { %405 = vadd.xlane.f32.xlu0 %v404_v13  ;;  %v393_v15 = vpop.f32.mrb[2].mxu0 }
 0x118   : > { %401 = vst.msk [vmem:[%s398_s10 + $0x8] sm:$0xff] %vm399_vm2, %v393_v15  ;;  %v670_v16 = vpop.f32.mrb[3].mxu0  ;;  %v419_v17 = vsel %vm399_vm2, %v417_v14, 0.0  ;;  %v418_v18 = vmul.f32 %v393_v15, %v393_v15  ;;  %v407_v19 = vsel %vm399_vm2, %v393_v15, 0.0 }
 0x119   : > { %420 = vadd.xlane.f32.xlu1 %v419_v17 }
 0x11a   : > { %v422_v20 = vsel %vm399_vm2, %v418_v18, 0.0 }
 0x11b   : > { %408 = vadd.xlane.f32.xlu0 %v407_v19 }
 0x11d   : > { %423 = vadd.xlane.f32.xlu1 %v422_v20 }
 0x1a4   : > { %v406_v22 = vpop.xlane.xlu0 %405 }
 0x1a5   : > { %v410_v24 = vadd.f32 %v406_v22, %v402_v21 }
 0x1a6   : > { %v421_v25 = vpop.xlane.xlu1 %420 }
 0x1a7   : > { %413 = vst.msk [vmem:[#allocation3] sm:$0xff] %vm412_vm3, %v410_v24  ;;  %v425_v27 = vadd.f32 %v421_v25, %v415_v23 }
 0x1a8   : > { %v409_v28 = vpop.xlane.xlu0 %408 }
 0x1a9   : > { %427 = vst.msk [vmem:[#allocation4] sm:$0xff] %vm412_vm3, %v425_v27  ;;  %v411_v30 = vadd.f32 %v409_v28, %v403_v26 }
 0x1aa   : > { %v424_v31 = vpop.xlane.xlu1 %423 }
 0x1ab   : > { %414 = vst.msk [vmem:[#allocation3 + $0x8] sm:$0xff] %vm412_vm3, %v411_v30  ;;  %v426_v32 = vadd.f32 %v424_v31, %v416_v29 }
 0x1ad   : > { %428 = vst.msk [vmem:[#allocation4 + $0x8] sm:$0xff] %vm412_vm3, %v426_v32 }
 0x1ae PF: > { %p633_p9 = scmp.ne.s32.totalorder %s756_s16, 1 }
 0x1af   : > { %p433_p10 = scmp.eq.s32.totalorder (!%p633_p9), %s752_s15, 0 }
 0x1b0   : > { %432 = sbr.rel (%p633_p9) target bundleno = 608 (0x260), region = 48 }
 0x1b7   : > { %438 = sbr.rel (!%p433_p10) target bundleno = 467 (0x1d3), region = 52  ;;  %v439_v33 = vld [vmem:[#allocation3] sm:$0xff] (%p433_p10)  ;;  %v444_v34 = vld [vmem:[#allocation4] sm:$0xff] (%p433_p10)  ;;  %v440_v37 = vld [vmem:[#allocation3 + $0x8] sm:$0xff] (%p433_p10)  ;;  %vm462_vm4 = vcmask (%p433_p10), 7168  }
 0x1b8   : > { %v442_v35 = vmul.f32 (%p433_p10), 0.0078125, %v439_v33  ;;  %v446_v36 = vmul.f32 (%p433_p10), 0.0078125, %v444_v34  ;;  %v445_v38 = vld [vmem:[#allocation4 + $0x8] sm:$0xff] (%p433_p10)  ;;  %v443_v39 = vmul.f32 (%p433_p10), 0.0078125, %v440_v37  ;;  %v458_v49 = vld [vmem:[%s901_s2] sm:$0xff] (%p433_p10)  ;;  %v459_v50 = vld [vmem:[%s901_s2 + $0x8] sm:$0xff] (%p433_p10) }
 0x1b9   : > { %v447_v40 = vmul.f32 (%p433_p10), 0.0078125, %v445_v38  ;;  %v465_v54 = vld [vmem:[%s902_s3] sm:$0xff] (%p433_p10)  ;;  %v466_v58 = vld [vmem:[%s902_s3 + $0x8] sm:$0xff] (%p433_p10) }
 0x1ba   : > { %v448_v41 = vmul.f32 (%p433_p10), %v442_v35, %v442_v35  ;;  %v449_v42 = vmul.f32 (%p433_p10), %v443_v39, %v443_v39  ;;  %v467_v51 = vmul.f32 (%p433_p10), %v458_v49, %v442_v35  ;;  %v468_v52 = vmul.f32 (%p433_p10), %v459_v50, %v443_v39 }
 0x1bc   : > { %v450_v43 = vsub.f32 (%p433_p10), %v446_v36, %v448_v41  ;;  %v451_v44 = vsub.f32 (%p433_p10), %v447_v40, %v449_v42 }
 0x1be   : > { %v452_v45 = vmax.f32 %v450_v43, 0.0  ;;  %v453_v46 = vmax.f32 %v451_v44, 0.0 }
 0x1c0   : > { %v454_v47 = vadd.f32 1e-05, %v452_v45  ;;  %v455_v48 = vadd.f32 1e-05, %v453_v46 }
 0x1c2   : > { %724 = vrsqrt.f32 %v454_v47 }
 0x1c3   : > { %726 = vrsqrt.f32 %v455_v48 }
 0x1cc   : > { %v725_v53 = vpop.eup %724 }
 0x1cd   : > { %v727_v55 = vpop.eup %726  ;;  %v460_v56 = vmul.f32 %v725_v53, %v458_v49  ;;  %v469_v57 = vmul.f32 %v725_v53, %v467_v51 }
 0x1ce   : > { %v461_v59 = vmul.f32 %v727_v55, %v459_v50  ;;  %v470_v60 = vmul.f32 %v727_v55, %v468_v52 }
 0x1cf   : > { %463 = vst.msk [vmem:[#allocation5] sm:$0xff] %vm462_vm4, %v460_v56  ;;  %v471_v61 = vsub.f32 %v465_v54, %v469_v57 }
 0x1d0   : > { %464 = vst.msk [vmem:[#allocation5 + $0x8] sm:$0xff] %vm462_vm4, %v461_v59  ;;  %v472_v62 = vsub.f32 %v466_v58, %v470_v60 }
 0x1d1   : > { %473 = vst.msk [vmem:[#allocation6] sm:$0xff] %vm462_vm4, %v471_v61 }
 0x1d2   : > { %474 = vst.msk [vmem:[#allocation6 + $0x8] sm:$0xff] %vm462_vm4, %v472_v62 }
 0x1d3 PF: > { %v773_v1 = vmov 0   ;;  %s635_s25 = sshll.u32 %s752_s15, 4  ;;  %vm507_vm5 = vcmask 523264  }
 0x1d4   : > { %729 = vset.pattern.permute.xlu1 %v773_v1  ;;  %728 = vset.pattern.permute.xlu0 %v773_v1  ;;  %s476_s26 = scalar_lea.vmem [#allocation2], %s635_s25 }
 0x1d5   : > { %v477_v4 = vld [vmem:[%s476_s26] sm:$0xff]  ;;  %v478_v8 = vld [vmem:[%s476_s26 + $0x8] sm:$0xff] }
 0x1d6   : > { %v479_v0 = vld [vmem:[#allocation5] sm:$0xff] }
 0x1d7   : > { %483 = vperm.xlu0 %728, %v479_v0   ;;  %v480_v3 = vld [vmem:[#allocation5 + $0x8] sm:$0xff] }
 0x1d8   : > { %v493_v63 = vld [vmem:[#allocation6] sm:$0xff] }
 0x1d9   : > { %497 = vperm.xlu1 %729, %v493_v63   ;;  %v494_v2 = vld [vmem:[#allocation6 + $0x8] sm:$0xff] }
 0x1db   : > { %488 = vperm.xlu0 %728, %v480_v3  }
 0x1dd   : > { %502 = vperm.xlu1 %729, %v494_v2  }
 0x256   : > { %v484_v6 = vpop.permute.xlu0 %483 }
 0x257   : > { %v491_v7 = vmul.f32 %v484_v6, %v477_v4 }
 0x258   : > { %v498_v5 = vpop.permute.xlu1 %497 }
 0x259   : > { %v505_v9 = vadd.f32 %v498_v5, %v491_v7 }
 0x25a   : > { %v489_v10 = vpop.permute.xlu0 %488 }
 0x25b   : > { %508 = vst.msk [vmem:[%s840_s29] sm:$0xff] %vm507_vm5, %v505_v9  ;;  %v492_v11 = vmul.f32 %v489_v10, %v478_v8 }
 0x25c   : > { %v503_v12 = vpop.permute.xlu1 %502 }
 0x25d   : > { %v506_v13 = vadd.f32 %v503_v12, %v492_v11 }
 0x25f   : > { %509 = vst.msk [vmem:[%s840_s29 + $0x8] sm:$0xff] %vm507_vm5, %v506_v13 }
 0x260 PF: > { %s14_s19 = sadd.s32 1, %s768_s19   ;;  %s904_s15 = smov %s760_s17 }
 0x261   : > { %p11_p11 = scmp.ge.s32.totalorder %s14_s19, 6   ;;  %s905_s16 = smov %s764_s18 }
 0x262   : > { %s906_s17 = smov %s909_s20  ;;  %s907_s18 = smov %s913_s21 }
 0x263   :  { %13 = sbr.rel (!%p11_p11) target bundleno = 3 (0x3), region = 84 }

// kernel: feature_extractor_forward.7
= control target key start
LH: loop header
LB: loop body
LE: loop exit
PB: predicated region body
PF: predicated region fallthrough
CT: control target
= control target key end

     0   :  { %s808_s15 = smov 0   ;;  %s810_s16 = smov 0   ;;  %s949_s0 = inlined_call_operand.vmem [shape: bf16[2,64,256], index: 0, kind: input, shape index: {}]   ;;  %s950_s1 = inlined_call_operand.vmem [shape: bf16[8,64], index: 1, kind: input, shape index: {}]   ;;  %s951_s2 = inlined_call_operand.vmem [shape: f32[8,1], index: 2, kind: input, shape index: {}]   ;;  %s952_s3 = inlined_call_operand.vmem [shape: f32[8,1], index: 3, kind: input, shape index: {}]   ;;  %s953_s4 = inlined_call_operand.vmem [shape: f32[2,8,256], index: 4, kind: output, shape index: {}]  }
   0x1   :  { %s812_s17 = smov 0   ;;  %s814_s18 = smov 0  }
   0x2   :  { %s816_s19 = smov 0   ;;  %s818_s20 = smov 0  }
   0x3   :  { %s820_s21 = smov 0   ;;  %s822_s22 = smov 0  }
   0x4   :  { %s824_s23 = smov 0  }
   0x5 LB: > { %s26_s24 = sadd.s32 1, %s765_s20  ;;  %s29_s25 = sadd.s32 1, %s769_s21  ;;  %s777_s23 = sphi %s824_s23, %s14_s23   ;;  %s773_s22 = sphi %s822_s22, %s968_s22   ;;  %s769_s21 = sphi %s820_s21, %s967_s21   ;;  %s765_s20 = sphi %s818_s20, %s966_s20   ;;  %s761_s19 = sphi %s816_s19, %s965_s19   ;;  %s757_s18 = sphi %s814_s18, %s964_s18   ;;  %s753_s17 = sphi %s812_s17, %s963_s17   ;;  %s749_s16 = sphi %s810_s16, %s962_s16   ;;  %s745_s15 = sphi %s808_s15, %s961_s15  }
   0x6   : > { %p27_p0 = scmp.ge.s32.totalorder %s26_s24, 2  ;;  %s33_s26 = sadd.s32 1, %s773_s22 }
   0x7   : > { %p55_p2 = scmp.ne.s32.totalorder %s749_s16, %s745_s15  ;;  %p56_p3 = scmp.eq.s32.totalorder %s777_s23, 0 }
   0x8   : > { %s970_s25 = smov (!%p27_p0, %s29_s25), %s769_s21  ;;  %s972_s24 = smov (%p27_p0, %s26_s24), 0 }
   0x9   : > { %p31_p1 = scmp.ge.s32.totalorder %s970_s25, 2  ;;  %p863_p4 = por %p56_p3, %p55_p2 }
   0xa   : > { %s37_s28 = ssub.s32 1, %s773_s22  ;;  %s48_s11 = sadd.s32 1, %s749_s16 }
   0xb   : > { %s974_s26 = smov (!%p31_p1, %s33_s26), %s773_s22  ;;  %s976_s25 = smov (%p31_p1, %s970_s25), 0 }
   0xc   : > { %p35_p5 = scmp.ge.s32.totalorder %s974_s26, 2  ;;  %957 = sst [smem:[#allocation8_spill]] %s976_s25 }
   0xd   : > { %s38_s29 = smul.u32 %s769_s21, %s37_s28  ;;  %p587_p7 = scmp.ge.s32.totalorder %s777_s23, 8 }
   0xe   : > { %s978_s26 = smov (%p35_p5, %s974_s26), 0  ;;  %s39_s30 = smul.u32 %s765_s20, %s37_s28 }
   0xf   : > { %958 = sst [smem:[#allocation9_spill]] %s978_s26  ;;  %s40_s5 = ssub.s32 1, %s978_s26 }
  0x10   : > { %s41_s6 = smul.u32 %s40_s5, %s976_s25 }
  0x11   : > { %s42_s7 = smul.u32 %s40_s5, %s972_s24 }
  0x12   : > { %s43_s8 = ssub.s32 %s38_s29, %s41_s6  ;;  %185 = sbr.rel (%p587_p7) target bundleno = 36 (0x24), region = 28 }
  0x13   : > { %s44_s9 = ssub.s32 %s39_s30, %s42_s7 }
  0x14   : > { %s45_s10 = sor.u32 %s44_s9, %s43_s8 }
  0x15   : > { %p46_p6 = scmp.eq.s32.totalorder %s45_s10, 0 }
  0x17   : > { %s879_s12 = scalar_select %p46_p6, %s749_s16, %s48_s11  }
  0x19   : > { %188 = sbr.rel (!%p863_p4) target bundleno = 36 (0x24), region = 32  ;;  %s190_s13 = sand.u32 (%p863_p4), 1, %s749_s16  }
  0x1a   : > { %s589_s14 = sshll.u32 (%p863_p4), %s38_s29, 4  ;;  %s588_s28 = sshll.u32 (%p863_p4), %s190_s13, 5 }
  0x1b   : > { %s197_s26 = sadd.s32 (%p863_p4), %s589_s14, %s39_s30  ;;  %s192_s8 = scalar_lea.vmem (%p863_p4), [#allocation7], %s588_s28 }
  0x1c   : > { %s590_s25 = sshll.u32 (%p863_p4), %s197_s26, 2 }
  0x1d   : > { %s199_s7 = scalar_lea.vmem (%p863_p4), %s949_s0, %s590_s25 }
  0x1e   : > { %v215_v0 = vld [vmem:[%s199_s7] sm:$0xf] (%p863_p4)  ;;  %v217_v1 = vld [vmem:[%s199_s7 + $0x8] sm:$0xf] (%p863_p4)  ;;  %v219_v2 = vld [vmem:[%s199_s7 + $0x10] sm:$0xf] (%p863_p4) }
  0x1f   : > { %216 = vst [vmem:[%s192_s8] sm:$0xf] (%p863_p4), %v215_v0  ;;  %218 = vst [vmem:[%s192_s8 + $0x4] sm:$0xf] (%p863_p4), %v217_v1  ;;  %v221_v3 = vld [vmem:[%s199_s7 + $0x18] sm:$0xf] (%p863_p4) }
  0x20   : > { %220 = vst [vmem:[%s192_s8 + $0x8] sm:$0xf] %v219_v2  ;;  %v223_v4 = vld [vmem:[%s199_s7 + $0x20] sm:$0xf]  ;;  %v225_v5 = vld [vmem:[%s199_s7 + $0x28] sm:$0xf] }
  0x21   : > { %222 = vst [vmem:[%s192_s8 + $0xc] sm:$0xf] %v221_v3  ;;  %224 = vst [vmem:[%s192_s8 + $0x10] sm:$0xf] %v223_v4  ;;  %v227_v6 = vld [vmem:[%s199_s7 + $0x30] sm:$0xf] }
  0x22   : > { %226 = vst [vmem:[%s192_s8 + $0x14] sm:$0xf] %v225_v5  ;;  %v229_v7 = vld [vmem:[%s199_s7 + $0x38] sm:$0xf]  ;;  %228 = vst [vmem:[%s192_s8 + $0x18] sm:$0xf] %v227_v6 }
  0x23   : > { %230 = vst [vmem:[%s192_s8 + $0x1c] sm:$0xf] %v229_v7 }
  0x24 PF: > { %p591_p8 = scmp.ge.s32.totalorder %s777_s23, 1  ;;  %p268_p9 = scmp.lt.s32.totalorder %s777_s23, 9 }
  0x26   : > { %p269_p10 = pnand %p591_p8, %p268_p9 }
  0x27   : > { %s275_s25 = sand.u32 (!%p269_p10), 1, %s745_s15   ;;  %s308_s26 = smul.u32 (!%p269_p10), %s757_s18, %s761_s19 }
  0x28   : > { %272 = sbr.rel (%p269_p10) target bundleno = 616 (0x268), region = 73  ;;  %s592_s27 = sshll.u32 (!%p269_p10), %s275_s25, 5 }
  0x29   : > { %s309_s29 = smul.u32 (!%p269_p10), %s753_s17, %s761_s19  ;;  %p310_p11 = scmp.lt.s32.totalorder (!%p269_p10), %s308_s26, 1 }
  0x2a   : > { %s595_s30 = sshll.u32 (!%p269_p10), %s757_s18, 1  ;;  %s277_s6 = scalar_lea.vmem (!%p269_p10), [#allocation7], %s592_s27 }
  0x2b   : > { %p312_p12 = scmp.lt.s32.totalorder (!%p269_p10), %s309_s29, 1  ;;  %s897_s10 = sadd.s32 (!%p269_p10), %s753_s17, %s595_s30 }
  0x2c   : > { %p596_p13 = scmp.ne.s32.totalorder (!%p269_p10), %s761_s19, 0 }
  0x2f   : > { %s980_s26 = smov (!%p310_p11, %s308_s26), 1  ;;  %s982_s29 = smov (!%p312_p12, %s309_s29), 1 }
  0x30   : > { %s593_s9 = sshll.u32 %s980_s26, 1  ;;  %326 = sbr.rel (%p596_p13) target bundleno = 440 (0x1b8), region = 81 }
  0x31   : > { %s315_s11 = sadd.s32 %s593_s9, %s982_s29  ;;  %p327_p0 = scmp.eq.s32.totalorder (!%p596_p13), %s757_s18, 0 }
  0x32   : > { %s594_s13 = sshll.u32 %s315_s11, 3  ;;  %p328_p1 = scmp.eq.s32.totalorder (!%p596_p13), %s753_s17, 0 }
  0x33   : > { %s902_s5 = scalar_lea.vmem %s953_s4, %s594_s13 }
  0x34   : > { %p329_p2 = pnand (!%p596_p13), %p328_p1, %p327_p0 }
  0x37   : > { %332 = sbr.rel (%p329_p2) target bundleno = 62 (0x3e), region = 85  ;;  %vm333_vm0 = vcmask (!%p329_p2), 7168   ;;  %v779_v8 = vmov (!%p329_p2), 0.0  }
  0x38   : > { %334 = vst.msk [vmem:[#allocation3] sm:$0xff] (!%p329_p2), %vm333_vm0, %v779_v8  ;;  %335 = vst.msk [vmem:[#allocation4] sm:$0xff] (!%p329_p2), %vm333_vm0, %v779_v8 }
  0x3e PF: > { %v700_v9 = vld [vmem:[%s277_s6] sm:$0xff]   ;;  %v780_v10 = vmov 0.0   ;;  %v701_v11 = vld [vmem:[%s277_s6 + $0x8] sm:$0xff]   ;;  %vm781_vm1 = vmmov 0   ;;  %v702_v12 = vld [vmem:[%s277_s6 + $0x10] sm:$0xff]   ;;  %vm369_vm2 = vcmask 523264  }
  0x3f   : > { %612 = vmatprep.subr.bf16.mxu0 %v780_v10  ;;  %620 = vmatprep.mubr.msk.bf16.mxu0 %vm781_vm1, %v780_v10  ;;  %v703_v13 = vld [vmem:[%s277_s6 + $0x18] sm:$0xff]   ;;  %v336_v14 = vld [vmem:[%s950_s1] sm:$0xf]  ;;  %s602_s8 = sshll.u32 %s897_s10, 3  ;;  %vm420_vm3 = vcmask 7168   ;;  %v422_v23 = vld [vmem:[#allocation4] sm:$0xff] }
  0x40   : > { %613 = vmatpush3.bf16.msra.mxu0 %v700_v9  ;;  %s414_s25 = scalar_lea.vmem [#allocation2], %s602_s8  ;;  %v416_v20 = vld [vmem:[#allocation3] sm:$0xff] }
  0x41   : > { %614 = vmatprep.subr.bf16.mxu0 %v780_v10 }
  0x44   : > { %615 = vmatpush3.bf16.msra.mxu0 %v701_v11 }
  0x45   : > { %616 = vmatprep.subr.bf16.mxu0 %v780_v10 }
  0x48   : > { %617 = vmatpush3.bf16.msra.mxu0 %v702_v12 }
  0x49   : > { %618 = vmatprep.subr.bf16.mxu0 %v780_v10 }
  0x4c   : > { %619 = vmatpush3.bf16.msra.mxu0 %v703_v13 }
  0x4f   : > { %621 = vmatmul.mubr.msk.bf16.vlgmr.msra.gmra.mrb[0].mxu0 %vm369_vm2, %v336_v14 }
 0x122   : > { %v407_v15 = vpop.f32.mrb[0].mxu0 }
 0x123   : > { %415 = vst [vmem:[%s414_s25] sm:$0xff] %v407_v15  ;;  %417 = vadd.xlane.f32.xlu0 %v407_v15  ;;  %v622_v16 = vpop.f32.mrb[1].mxu0  ;;  %v423_v19 = vmul.f32 %v407_v15, %v407_v15 }
 0x124   : > { %v410_v17 = vpop.f32.mrb[2].mxu0 }
 0x125   : > { %v623_v18 = vpop.f32.mrb[3].mxu0 }
 0x127   : > { %424 = vadd.xlane.f32.xlu0 %v423_v19 }
 0x1b0   : > { %v418_v21 = vpop.xlane.xlu0 %417 }
 0x1b1   : > { %v419_v22 = vadd.f32 %v418_v21, %v416_v20 }
 0x1b3   : > { %421 = vst.msk [vmem:[#allocation3] sm:$0xff] %vm420_vm3, %v419_v22 }
 0x1b4   : > { %v425_v24 = vpop.xlane.xlu0 %424 }
 0x1b5   : > { %v426_v25 = vadd.f32 %v425_v24, %v422_v23 }
 0x1b7   : > { %427 = vst.msk [vmem:[#allocation4] sm:$0xff] %vm420_vm3, %v426_v25 }
 0x1b8 PF: > { %p603_p3 = scmp.ne.s32.totalorder %s761_s19, 1 }
 0x1b9   : > { %p432_p4 = scmp.eq.s32.totalorder (!%p603_p3), %s757_s18, 0  ;;  %p433_p5 = scmp.eq.s32.totalorder (!%p603_p3), %s753_s17, 0 }
 0x1ba   : > { %431 = sbr.rel (%p603_p3) target bundleno = 616 (0x268), region = 89 }
 0x1bb   : > { %p434_p6 = pnand (!%p603_p3), %p433_p5, %p432_p4 }
 0x1c1   : > { %437 = sbr.rel (%p434_p6) target bundleno = 476 (0x1dc), region = 93  ;;  %v438_v26 = vld [vmem:[#allocation3] sm:$0xff] (!%p434_p6)  ;;  %v441_v27 = vld [vmem:[#allocation4] sm:$0xff] (!%p434_p6)  ;;  %vm450_vm4 = vcmask (!%p434_p6), 7168  }
 0x1c2   : > { %v440_v28 = vmul.f32 (!%p434_p6), 0.001953125, %v438_v26  ;;  %v442_v29 = vmul.f32 (!%p434_p6), 0.001953125, %v441_v27  ;;  %v448_v34 = vld [vmem:[%s951_s2] sm:$0xff] (!%p434_p6) }
 0x1c3   : > { %v452_v37 = vld [vmem:[%s952_s3] sm:$0xff] (!%p434_p6) }
 0x1c4   : > { %v443_v30 = vmul.f32 (!%p434_p6), %v440_v28, %v440_v28  ;;  %v453_v35 = vmul.f32 (!%p434_p6), %v448_v34, %v440_v28 }
 0x1c6   : > { %v444_v31 = vsub.f32 (!%p434_p6), %v442_v29, %v443_v30 }
 0x1c8   : > { %v445_v32 = vmax.f32 %v444_v31, 0.0 }
 0x1ca   : > { %v446_v33 = vadd.f32 1e-05, %v445_v32 }
 0x1cc   : > { %704 = vrsqrt.f32 %v446_v33 }
 0x1d6   : > { %v705_v36 = vpop.eup %704 }
 0x1d7   : > { %v449_v38 = vmul.f32 %v705_v36, %v448_v34  ;;  %v454_v39 = vmul.f32 %v705_v36, %v453_v35 }
 0x1d9   : > { %451 = vst.msk [vmem:[#allocation5] sm:$0xff] %vm450_vm4, %v449_v38  ;;  %v455_v40 = vsub.f32 %v452_v37, %v454_v39 }
 0x1db   : > { %456 = vst.msk [vmem:[#allocation6] sm:$0xff] %vm450_vm4, %v455_v40 }
 0x1dc PF: > { %v782_v42 = vmov 0   ;;  %s604_s19 = sshll.u32 %s897_s10, 3 }
 0x1dd   : > { %706 = vset.pattern.permute.xlu0 %v782_v42  ;;  %s458_s29 = scalar_lea.vmem [#allocation2], %s604_s19 }
 0x1de   : > { %v459_v45 = vld [vmem:[%s458_s29] sm:$0xff] }
 0x1e0   : > { %v460_v41 = vld [vmem:[#allocation5] sm:$0xff] }
 0x1e1   : > { %463 = vperm.xlu0 %706, %v460_v41  }
 0x1e2   : > { %v467_v43 = vld [vmem:[#allocation6] sm:$0xff] }
 0x1e5   : > { %470 = vperm.xlu0 %706, %v467_v43  }
 0x260   : > { %v464_v44 = vpop.permute.xlu0 %463 }
 0x261   : > { %v466_v46 = vmul.f32 %v464_v44, %v459_v45 }
 0x264   : > { %v471_v47 = vpop.permute.xlu0 %470 }
 0x265   : > { %v473_v48 = vadd.f32 %v471_v47, %v466_v46 }
 0x267   : > { %474 = vst [vmem:[%s902_s5] sm:$0xff] %v473_v48 }
 0x268 PF: > { %s14_s23 = sadd.s32 1, %s777_s23   ;;  %s959_s30 = sld [smem:[#allocation8_spill]] }
 0x269   : > { %p11_p7 = scmp.ge.s32.totalorder %s14_s23, 10   ;;  %s960_s9 = sld [smem:[#allocation9_spill]] }
 0x26a   : > { %s961_s15 = smov %s749_s16  ;;  %s962_s16 = smov %s879_s12 }
 0x26b   : > { %s963_s17 = smov %s765_s20  ;;  %s964_s18 = smov %s769_s21 }
 0x26c   : > { %s965_s19 = smov %s773_s22  ;;  %s966_s20 = smov %s972_s24 }
 0x26d   :  { %13 = sbr.rel (!%p11_p7) target bundleno = 5 (0x5), region = 130 }
 0x26e   : > { %s967_s21 = smov %s959_s30 }
 0x26f   : > { %s968_s22 = smov %s960_s9 }

</bundles_post_ra>
